<compile_context>
chip_gen: v7x
topology: tpu7x:2x2x1
jax: 0.10.0
libtpu: 0.0.40
codegen_flags: <defaults>
</compile_context>

<pallas_src>
import math

import jax
import jax.numpy as jnp
from jax.experimental import pallas as pl
from jax.experimental.pallas import tpu as pltpu

# ---- model config (small, consistent with GPT2.__init__ signature) ----
LAYERS = 2
PAD_IDX = 0
VOCAB = 64
MAX_SEQ = 16
HEADS = 4
DIMS = 32
RATE = 4
EPS = 1e-5          # nn.LayerNorm default eps

BATCH = 2
SEQ = 8

D_FF = DIMS * RATE
D_HEAD = DIMS // HEADS
N_TOK = BATCH * SEQ            # flattened (batch, seq) rows
NEG = -1e9                     # key-padding mask bias
CROSS_NEG = -2e9               # cross-batch mask bias (flattened-batch attention)


# ---------------------------------------------------------------------------
# Kernel
# ---------------------------------------------------------------------------
def _layernorm(v, g, b, out_dtype):
    mu = jnp.mean(v, axis=-1, keepdims=True)
    var = jnp.mean((v - mu) ** 2, axis=-1, keepdims=True)
    return ((v - mu) * jax.lax.rsqrt(var + EPS) * g + b).astype(out_dtype)


def gpt2_kernel(x_ref, bias_ref, hmask_ref,
                ln1_g, ln1_b, wqkv, bqkv, wo, bo,
                ln2_g, ln2_b, w1, b1, w2, b2,
                lnh_g, lnh_b,
                out_ref):
    """Fully fused GPT2 forward (embedding gathers done outside):
    LAYERS x (pre-LN MHA + pre-LN FFN) + final ln_head, whole batch at once.

    Attention is merged-head / flattened-batch: K and V are tiled HEADS times
    along rows and masked block-diagonally with `hmask`, so per-head scores,
    softmax denominators and contexts for ALL heads come from plain 2-D MXU
    matmuls -- no per-head slices, no transposes, no scratch round-trip."""
    x = x_ref[...]                       # (N, D)   f32 residual stream
    bias = bias_ref[...]                 # (N, H*N) f32 pad + cross-batch bias
    hmask = hmask_ref[...]               # (H*N, D) f32 block-diagonal head mask

    for l in range(LAYERS):              # static unroll over layers
        # ---------------- pre-LN multi-head attention ----------------
        a = _layernorm(x, ln1_g[l], ln1_b[l], jnp.bfloat16)
        qkv = jnp.dot(a, wqkv[l],
                      preferred_element_type=jnp.float32) + bqkv[l]      # (N, 3D) f32
        q = qkv[:, :DIMS]                # 1/sqrt(D_HEAD) already folded into wq/bq
        k = qkv[:, DIMS:2 * DIMS]
        v = qkv[:, 2 * DIMS:]

        # Tile K / V over heads (rows) and mask to block-diagonal head layout.
        k_big = (jnp.concatenate([k] * HEADS, axis=0) * hmask).astype(jnp.bfloat16)
        v_big = (jnp.concatenate([v] * HEADS, axis=0) * hmask).astype(jnp.bfloat16)

        # scores[n, h*N + m] = sum_{d in head h} q[n, d] * k[m, d]
        s = jnp.einsum('nc,rc->nr', q.astype(jnp.bfloat16), k_big,
                       preferred_element_type=jnp.float32)               # (N, H*N)
        s = s + bias
        s = s - jnp.max(s, axis=-1, keepdims=True)   # row shift (constant per segment)
        p = jnp.exp(s)                                                   # f32

        # Per-head softmax denominator, broadcast back to the concat-head
        # feature layout with one tiny f32 matmul against the same head mask.
        denom = jnp.dot(p, hmask, preferred_element_type=jnp.float32)    # (N, D)
        denom = jnp.maximum(denom, 1e-30)            # guard against full underflow

        ctx = jnp.dot(p.astype(jnp.bfloat16), v_big,
                      preferred_element_type=jnp.float32)                # (N, D)
        ctx = ctx * pl.reciprocal(denom, approx=True)

        attn = jnp.dot(ctx.astype(jnp.bfloat16), wo[l],
                       preferred_element_type=jnp.float32) + bo[l]
        x = x + attn

        # ---------------- pre-LN position-wise feed-forward ----------------
        hf = _layernorm(x, ln2_g[l], ln2_b[l], jnp.bfloat16)
        hf = jnp.dot(hf, w1[l], preferred_element_type=jnp.float32) + b1[l]
        # TODO(synk): upstream PositionwiseFeedForward activation is not shown;
        # standard GPT-2 GELU (tanh approximation) is used here.
        hf = jax.nn.gelu(hf, approximate=True)
        hf = jnp.dot(hf.astype(jnp.bfloat16), w2[l],
                     preferred_element_type=jnp.float32) + b2[l]
        x = x + hf

    # final ln_head
    out_ref[...] = _layernorm(x, lnh_g[...], lnh_b[...], jnp.float32)


# ---------------------------------------------------------------------------
# Wrapper
# ---------------------------------------------------------------------------
_W_ORDER = ('ln1_g', 'ln1_b', 'wqkv', 'bqkv', 'wo', 'bo',
            'ln2_g', 'ln2_b', 'w1', 'b1', 'w2', 'b2')


def _fuse_layer_params(layers):
    """Stack per-layer weights along a leading layer axis, fuse Q/K/V, fold the
    1/sqrt(D_HEAD) attention scale into wq/bq, cast matmul weights to bf16
    (biases / LN params stay f32)."""
    scale = 1.0 / math.sqrt(D_HEAD)
    stk = lambda key: jnp.stack([l[key] for l in layers])
    wqkv = jnp.stack([jnp.concatenate([l['wq'] * scale, l['wk'], l['wv']], axis=-1)
                      for l in layers]).astype(jnp.bfloat16)             # (L, D, 3D)
    bqkv = jnp.stack([jnp.concatenate([l['bq'] * scale, l['bk'], l['bv']], axis=-1)
                      for l in layers])                                  # (L, 1, 3D)
    return {
        'ln1_g': stk('ln1_g'), 'ln1_b': stk('ln1_b'),
        'wqkv': wqkv, 'bqkv': bqkv,
        'wo': stk('wo').astype(jnp.bfloat16), 'bo': stk('bo'),
        'ln2_g': stk('ln2_g'), 'ln2_b': stk('ln2_b'),
        'w1': stk('w1').astype(jnp.bfloat16), 'b1': stk('b1'),
        'w2': stk('w2').astype(jnp.bfloat16), 'b2': stk('b2'),
    }


def _attention_bias(ids):
    """(N, HEADS*N) additive bias: key-padding mask plus cross-batch block mask
    for the flattened-batch merged-head attention (precomputed once; no
    in-kernel broadcasting)."""
    B, S = ids.shape
    n = B * S
    ids_flat = ids.reshape(n)
    batch_of = jnp.arange(n, dtype=jnp.int32) // S
    key_bias = jnp.where(ids_flat == PAD_IDX, NEG, 0.0).astype(jnp.float32)   # (n,)
    same = batch_of[:, None] == batch_of[None, :]                             # (n, n)
    base = jnp.where(same, key_bias[None, :], CROSS_NEG).astype(jnp.float32)  # (n, n)
    return jnp.tile(base, (1, HEADS))                                         # (n, H*n)


def _head_mask():
    """(HEADS*N, D) block-diagonal mask: row h*N+m keeps only head h's columns."""
    row_head = jnp.arange(HEADS * N_TOK, dtype=jnp.int32) // N_TOK
    col_head = jnp.arange(DIMS, dtype=jnp.int32) // D_HEAD
    return (row_head[:, None] == col_head[None, :]).astype(jnp.float32)


def gpt2_forward(ids, params):
    """GPT2.forward in eval mode, past=None (offset=0), bidirectional=True."""
    B, S = ids.shape
    # Embedding glue (pure gathers) in plain JAX: token + positional embedding.
    tok = jnp.take(params['tok_emb'], ids, axis=0)                       # (B, S, D)
    pos = params['pos_emb'][:S][None, :, :]                              # (1, S, D)
    x2d = (tok + pos).astype(jnp.float32).reshape(B * S, DIMS)
    # dropout_embedding: eval mode -> identity.

    bias_big = _attention_bias(ids)                                      # (N, H*N)
    hmask = _head_mask()                                                 # (H*N, D)

    fused = _fuse_layer_params(params['layers'])
    args = [x2d, bias_big, hmask] + [fused[k] for k in _W_ORDER] \
        + [params['ln_head_g'], params['ln_head_b']]

    vmem = pl.BlockSpec(memory_space=pltpu.MemorySpace.VMEM)
    out2d = pl.pallas_call(
        gpt2_kernel,
        out_shape=jax.ShapeDtypeStruct((B * S, DIMS), jnp.float32),
        in_specs=[vmem] * len(args),
        out_specs=vmem,
    )(*args)
    # TODO(synk): per-layer eval-mode `present` (k, v) cache is not materialized.
    return out2d.reshape(B, S, DIMS)


# ---------------------------------------------------------------------------
# Deterministic parameter init (synthetic; shapes follow the module __init__)
# ---------------------------------------------------------------------------
def init_params(key):
    ks = iter(jax.random.split(key, 4 + LAYERS * 8))

    def nrm(shape, scale=0.02):
        return (scale * jax.random.normal(next(ks), shape)).astype(jnp.float32)

    params = {
        'tok_emb': nrm((VOCAB, DIMS)),
        'pos_emb': nrm((MAX_SEQ, DIMS)),
        'ln_head_g': jnp.ones((1, DIMS), jnp.float32),
        'ln_head_b': jnp.zeros((1, DIMS), jnp.float32),
        'layers': [],
    }
    for _ in range(LAYERS):
        params['layers'].append({
            'ln1_g': jnp.ones((1, DIMS), jnp.float32),
            'ln1_b': jnp.zeros((1, DIMS), jnp.float32),
            'wq': nrm((DIMS, DIMS)), 'bq': jnp.zeros((1, DIMS), jnp.float32),
            'wk': nrm((DIMS, DIMS)), 'bk': jnp.zeros((1, DIMS), jnp.float32),
            'wv': nrm((DIMS, DIMS)), 'bv': jnp.zeros((1, DIMS), jnp.float32),
            'wo': nrm((DIMS, DIMS)), 'bo': jnp.zeros((1, DIMS), jnp.float32),
            'ln2_g': jnp.ones((1, DIMS), jnp.float32),
            'ln2_b': jnp.zeros((1, DIMS), jnp.float32),
            'w1': nrm((DIMS, D_FF)), 'b1': jnp.zeros((1, D_FF), jnp.float32),
            'w2': nrm((D_FF, DIMS)), 'b2': jnp.zeros((1, DIMS), jnp.float32),
        })
    return params


if __name__ == "__main__":
    key = jax.random.PRNGKey(0)
    pkey, ikey = jax.random.split(key)
    params = init_params(pkey)
    ids = jax.random.randint(ikey, (BATCH, SEQ), 0, VOCAB, dtype=jnp.int32)

    out = gpt2_forward(ids, params)
    out = jax.block_until_ready(out)

    assert out.shape == (BATCH, SEQ, DIMS)
    assert jnp.all(jnp.isfinite(out))
    print("KERNEL_OK")
</pallas_src>

<mosaic_0001>
module attributes {stable_mosaic.version = 11 : i64} {
  func.func @gpt2_kernel(%arg0: memref<16x32xf32, #tpu.memory_space<vmem>>, %arg1: memref<16x64xf32, #tpu.memory_space<vmem>>, %arg2: memref<64x32xf32, #tpu.memory_space<vmem>>, %arg3: memref<2x1x32xf32, #tpu.memory_space<vmem>>, %arg4: memref<2x1x32xf32, #tpu.memory_space<vmem>>, %arg5: memref<2x32x96xbf16, #tpu.memory_space<vmem>>, %arg6: memref<2x1x96xf32, #tpu.memory_space<vmem>>, %arg7: memref<2x32x32xbf16, #tpu.memory_space<vmem>>, %arg8: memref<2x1x32xf32, #tpu.memory_space<vmem>>, %arg9: memref<2x1x32xf32, #tpu.memory_space<vmem>>, %arg10: memref<2x1x32xf32, #tpu.memory_space<vmem>>, %arg11: memref<2x32x128xbf16, #tpu.memory_space<vmem>>, %arg12: memref<2x1x128xf32, #tpu.memory_space<vmem>>, %arg13: memref<2x128x32xbf16, #tpu.memory_space<vmem>>, %arg14: memref<2x1x32xf32, #tpu.memory_space<vmem>>, %arg15: memref<1x32xf32, #tpu.memory_space<vmem>>, %arg16: memref<1x32xf32, #tpu.memory_space<vmem>>, %arg17: memref<16x32xf32, #tpu.memory_space<vmem>>) attributes {dimension_semantics = [], scalar_prefetch = 0 : i64, scratch_operands = 0 : i64, tpu.core_type = #tpu.core_type<tc>} {
    %c0 = arith.constant 0 : index
    %c0_0 = arith.constant 0 : index
    %0 = vector.load %arg0[%c0, %c0_0] : memref<16x32xf32, #tpu.memory_space<vmem>>, vector<16x32xf32>
    %c0_1 = arith.constant 0 : index
    %c0_2 = arith.constant 0 : index
    %1 = vector.load %arg1[%c0_1, %c0_2] : memref<16x64xf32, #tpu.memory_space<vmem>>, vector<16x64xf32>
    %c0_3 = arith.constant 0 : index
    %c0_4 = arith.constant 0 : index
    %2 = vector.load %arg2[%c0_3, %c0_4] : memref<64x32xf32, #tpu.memory_space<vmem>>, vector<64x32xf32>
    %c0_5 = arith.constant 0 : index
    %c0_6 = arith.constant 0 : index
    %c0_7 = arith.constant 0 : index
    %3 = vector.load %arg3[%c0_5, %c0_6, %c0_7] : memref<2x1x32xf32, #tpu.memory_space<vmem>>, vector<1x1x32xf32>
    %4 = vector.shape_cast %3 : vector<1x1x32xf32> to vector<1x32xf32>
    %c0_8 = arith.constant 0 : index
    %c0_9 = arith.constant 0 : index
    %c0_10 = arith.constant 0 : index
    %5 = vector.load %arg4[%c0_8, %c0_9, %c0_10] : memref<2x1x32xf32, #tpu.memory_space<vmem>>, vector<1x1x32xf32>
    %6 = vector.shape_cast %5 : vector<1x1x32xf32> to vector<1x32xf32>
    %cst = arith.constant dense<0.000000e+00> : vector<16xf32>
    %7 = vector.multi_reduction <add>, %0, %cst [1] : vector<16x32xf32> to vector<16xf32>
    %8 = vector.shape_cast %7 : vector<16xf32> to vector<16x1xf32>
    %cst_11 = arith.constant 3.200000e+01 : f32
    %9 = vector.broadcast %cst_11 : f32 to vector<16x1xf32>
    %10 = arith.divf %8, %9 : vector<16x1xf32>
    %11 = vector.broadcast %10 : vector<16x1xf32> to vector<16x32xf32>
    %12 = arith.subf %0, %11 : vector<16x32xf32>
    %13 = arith.mulf %12, %12 : vector<16x32xf32>
    %cst_12 = arith.constant dense<0.000000e+00> : vector<16xf32>
    %14 = vector.multi_reduction <add>, %13, %cst_12 [1] : vector<16x32xf32> to vector<16xf32>
    %15 = vector.shape_cast %14 : vector<16xf32> to vector<16x1xf32>
    %cst_13 = arith.constant 3.200000e+01 : f32
    %16 = vector.broadcast %cst_13 : f32 to vector<16x1xf32>
    %17 = arith.divf %15, %16 : vector<16x1xf32>
    %18 = vector.broadcast %10 : vector<16x1xf32> to vector<16x32xf32>
    %19 = arith.subf %0, %18 : vector<16x32xf32>
    %cst_14 = arith.constant 9.99999974E-6 : f32
    %20 = vector.broadcast %cst_14 : f32 to vector<16x1xf32>
    %21 = arith.addf %17, %20 : vector<16x1xf32>
    %22 = math.rsqrt %21 : vector<16x1xf32>
    %23 = vector.broadcast %22 : vector<16x1xf32> to vector<16x32xf32>
    %24 = arith.mulf %19, %23 : vector<16x32xf32>
    %25 = vector.broadcast %4 : vector<1x32xf32> to vector<16x32xf32>
    %26 = arith.mulf %24, %25 : vector<16x32xf32>
    %27 = vector.broadcast %6 : vector<1x32xf32> to vector<16x32xf32>
    %28 = arith.addf %26, %27 : vector<16x32xf32>
    %29 = arith.truncf %28 : vector<16x32xf32> to vector<16x32xbf16>
    %c0_15 = arith.constant 0 : index
    %c0_16 = arith.constant 0 : index
    %c0_17 = arith.constant 0 : index
    %30 = vector.load %arg5[%c0_15, %c0_16, %c0_17] : memref<2x32x96xbf16, #tpu.memory_space<vmem>>, vector<1x32x96xbf16>
    %31 = vector.shape_cast %30 : vector<1x32x96xbf16> to vector<32x96xbf16>
    %cst_18 = arith.constant dense<0.000000e+00> : vector<16x96xf32>
    %32 = tpu.matmul %29, %31, %cst_18 {dimension_numbers = #tpu.dot_dimension_numbers<[1], [0], [0], [1], [0, 0, 1, 1], [], []>} : vector<16x32xbf16>, vector<32x96xbf16>, vector<16x96xf32> -> vector<16x96xf32>
    %c0_19 = arith.constant 0 : index
    %c0_20 = arith.constant 0 : index
    %c0_21 = arith.constant 0 : index
    %33 = vector.load %arg6[%c0_19, %c0_20, %c0_21] : memref<2x1x96xf32, #tpu.memory_space<vmem>>, vector<1x1x96xf32>
    %34 = vector.shape_cast %33 : vector<1x1x96xf32> to vector<1x96xf32>
    %35 = vector.broadcast %34 : vector<1x96xf32> to vector<16x96xf32>
    %36 = arith.addf %32, %35 : vector<16x96xf32>
    %37 = vector.extract_strided_slice %36 {offsets = [0, 0], sizes = [16, 32], strides = [1, 1]} : vector<16x96xf32> to vector<16x32xf32>
    %38 = vector.extract_strided_slice %36 {offsets = [0, 32], sizes = [16, 32], strides = [1, 1]} : vector<16x96xf32> to vector<16x32xf32>
    %39 = vector.extract_strided_slice %36 {offsets = [0, 64], sizes = [16, 32], strides = [1, 1]} : vector<16x96xf32> to vector<16x32xf32>
    %40 = tpu.concatenate %38, %38, %38, %38 in 0 : vector<16x32xf32>, vector<16x32xf32>, vector<16x32xf32>, vector<16x32xf32> -> vector<64x32xf32>
    %41 = arith.mulf %40, %2 : vector<64x32xf32>
    %42 = arith.truncf %41 : vector<64x32xf32> to vector<64x32xbf16>
    %43 = tpu.concatenate %39, %39, %39, %39 in 0 : vector<16x32xf32>, vector<16x32xf32>, vector<16x32xf32>, vector<16x32xf32> -> vector<64x32xf32>
    %44 = arith.mulf %43, %2 : vector<64x32xf32>
    %45 = arith.truncf %44 : vector<64x32xf32> to vector<64x32xbf16>
    %46 = arith.truncf %37 : vector<16x32xf32> to vector<16x32xbf16>
    "tpu.trace_start"() <{level = 10 : i32, message = "nc,rc->nr"}> : () -> ()
    %cst_22 = arith.constant dense<0.000000e+00> : vector<16x64xf32>
    %47 = tpu.matmul %46, %42, %cst_22 {dimension_numbers = #tpu.dot_dimension_numbers<[1], [1], [0], [0], [0, 0, 1, 0], [], []>} : vector<16x32xbf16>, vector<64x32xbf16>, vector<16x64xf32> -> vector<16x64xf32>
    "tpu.trace_stop"() : () -> ()
    %48 = arith.addf %47, %1 : vector<16x64xf32>
    %cst_23 = arith.constant dense<0xFF800000> : vector<16xf32>
    %49 = vector.multi_reduction <maximumf>, %48, %cst_23 [1] : vector<16x64xf32> to vector<16xf32>
    %50 = vector.shape_cast %49 : vector<16xf32> to vector<16x1xf32>
    %51 = vector.broadcast %50 : vector<16x1xf32> to vector<16x64xf32>
    %52 = arith.subf %48, %51 : vector<16x64xf32>
    %53 = math.exp %52 : vector<16x64xf32>
    %cst_24 = arith.constant dense<0.000000e+00> : vector<16x32xf32>
    %54 = tpu.matmul %53, %2, %cst_24 {dimension_numbers = #tpu.dot_dimension_numbers<[1], [0], [0], [1], [0, 0, 1, 1], [], []>} : vector<16x64xf32>, vector<64x32xf32>, vector<16x32xf32> -> vector<16x32xf32>
    %cst_25 = arith.constant 1.000000e-30 : f32
    %55 = vector.broadcast %cst_25 : f32 to vector<16x32xf32>
    %56 = arith.maximumf %54, %55 : vector<16x32xf32>
    %57 = arith.truncf %53 : vector<16x64xf32> to vector<16x64xbf16>
    %cst_26 = arith.constant dense<0.000000e+00> : vector<16x32xf32>
    %58 = tpu.matmul %57, %45, %cst_26 {dimension_numbers = #tpu.dot_dimension_numbers<[1], [0], [0], [1], [0, 0, 1, 1], [], []>} : vector<16x64xbf16>, vector<64x32xbf16>, vector<16x32xf32> -> vector<16x32xf32>
    %59 = tpu.reciprocal %56 {approx = true} : vector<16x32xf32> -> vector<16x32xf32>
    %60 = arith.mulf %58, %59 : vector<16x32xf32>
    %61 = arith.truncf %60 : vector<16x32xf32> to vector<16x32xbf16>
    %c0_27 = arith.constant 0 : index
    %c0_28 = arith.constant 0 : index
    %c0_29 = arith.constant 0 : index
    %62 = vector.load %arg7[%c0_27, %c0_28, %c0_29] : memref<2x32x32xbf16, #tpu.memory_space<vmem>>, vector<1x32x32xbf16>
    %63 = vector.shape_cast %62 : vector<1x32x32xbf16> to vector<32x32xbf16>
    %cst_30 = arith.constant dense<0.000000e+00> : vector<16x32xf32>
    %64 = tpu.matmul %61, %63, %cst_30 {dimension_numbers = #tpu.dot_dimension_numbers<[1], [0], [0], [1], [0, 0, 1, 1], [], []>} : vector<16x32xbf16>, vector<32x32xbf16>, vector<16x32xf32> -> vector<16x32xf32>
    %c0_31 = arith.constant 0 : index
    %c0_32 = arith.constant 0 : index
    %c0_33 = arith.constant 0 : index
    %65 = vector.load %arg8[%c0_31, %c0_32, %c0_33] : memref<2x1x32xf32, #tpu.memory_space<vmem>>, vector<1x1x32xf32>
    %66 = vector.shape_cast %65 : vector<1x1x32xf32> to vector<1x32xf32>
    %67 = vector.broadcast %66 : vector<1x32xf32> to vector<16x32xf32>
    %68 = arith.addf %64, %67 : vector<16x32xf32>
    %69 = arith.addf %0, %68 : vector<16x32xf32>
    %c0_34 = arith.constant 0 : index
    %c0_35 = arith.constant 0 : index
    %c0_36 = arith.constant 0 : index
    %70 = vector.load %arg9[%c0_34, %c0_35, %c0_36] : memref<2x1x32xf32, #tpu.memory_space<vmem>>, vector<1x1x32xf32>
    %71 = vector.shape_cast %70 : vector<1x1x32xf32> to vector<1x32xf32>
    %c0_37 = arith.constant 0 : index
    %c0_38 = arith.constant 0 : index
    %c0_39 = arith.constant 0 : index
    %72 = vector.load %arg10[%c0_37, %c0_38, %c0_39] : memref<2x1x32xf32, #tpu.memory_space<vmem>>, vector<1x1x32xf32>
    %73 = vector.shape_cast %72 : vector<1x1x32xf32> to vector<1x32xf32>
    %cst_40 = arith.constant dense<0.000000e+00> : vector<16xf32>
    %74 = vector.multi_reduction <add>, %69, %cst_40 [1] : vector<16x32xf32> to vector<16xf32>
    %75 = vector.shape_cast %74 : vector<16xf32> to vector<16x1xf32>
    %cst_41 = arith.constant 3.200000e+01 : f32
    %76 = vector.broadcast %cst_41 : f32 to vector<16x1xf32>
    %77 = arith.divf %75, %76 : vector<16x1xf32>
    %78 = vector.broadcast %77 : vector<16x1xf32> to vector<16x32xf32>
    %79 = arith.subf %69, %78 : vector<16x32xf32>
    %80 = arith.mulf %79, %79 : vector<16x32xf32>
    %cst_42 = arith.constant dense<0.000000e+00> : vector<16xf32>
    %81 = vector.multi_reduction <add>, %80, %cst_42 [1] : vector<16x32xf32> to vector<16xf32>
    %82 = vector.shape_cast %81 : vector<16xf32> to vector<16x1xf32>
    %cst_43 = arith.constant 3.200000e+01 : f32
    %83 = vector.broadcast %cst_43 : f32 to vector<16x1xf32>
    %84 = arith.divf %82, %83 : vector<16x1xf32>
    %85 = vector.broadcast %77 : vector<16x1xf32> to vector<16x32xf32>
    %86 = arith.subf %69, %85 : vector<16x32xf32>
    %cst_44 = arith.constant 9.99999974E-6 : f32
    %87 = vector.broadcast %cst_44 : f32 to vector<16x1xf32>
    %88 = arith.addf %84, %87 : vector<16x1xf32>
    %89 = math.rsqrt %88 : vector<16x1xf32>
    %90 = vector.broadcast %89 : vector<16x1xf32> to vector<16x32xf32>
    %91 = arith.mulf %86, %90 : vector<16x32xf32>
    %92 = vector.broadcast %71 : vector<1x32xf32> to vector<16x32xf32>
    %93 = arith.mulf %91, %92 : vector<16x32xf32>
    %94 = vector.broadcast %73 : vector<1x32xf32> to vector<16x32xf32>
    %95 = arith.addf %93, %94 : vector<16x32xf32>
    %96 = arith.truncf %95 : vector<16x32xf32> to vector<16x32xbf16>
    %c0_45 = arith.constant 0 : index
    %c0_46 = arith.constant 0 : index
    %c0_47 = arith.constant 0 : index
    %97 = vector.load %arg11[%c0_45, %c0_46, %c0_47] : memref<2x32x128xbf16, #tpu.memory_space<vmem>>, vector<1x32x128xbf16>
    %98 = vector.shape_cast %97 : vector<1x32x128xbf16> to vector<32x128xbf16>
    %cst_48 = arith.constant dense<0.000000e+00> : vector<16x128xf32>
    %99 = tpu.matmul %96, %98, %cst_48 {dimension_numbers = #tpu.dot_dimension_numbers<[1], [0], [0], [1], [0, 0, 1, 1], [], []>} : vector<16x32xbf16>, vector<32x128xbf16>, vector<16x128xf32> -> vector<16x128xf32>
    %c0_49 = arith.constant 0 : index
    %c0_50 = arith.constant 0 : index
    %c0_51 = arith.constant 0 : index
    %100 = vector.load %arg12[%c0_49, %c0_50, %c0_51] : memref<2x1x128xf32, #tpu.memory_space<vmem>>, vector<1x1x128xf32>
    %101 = vector.shape_cast %100 : vector<1x1x128xf32> to vector<1x128xf32>
    %102 = vector.broadcast %101 : vector<1x128xf32> to vector<16x128xf32>
    %103 = arith.addf %99, %102 : vector<16x128xf32>
    %104 = arith.mulf %103, %103 : vector<16x128xf32>
    %105 = arith.mulf %103, %104 : vector<16x128xf32>
    %cst_52 = arith.constant 4.471500e-02 : f32
    %106 = vector.broadcast %cst_52 : f32 to vector<16x128xf32>
    %107 = arith.mulf %106, %105 : vector<16x128xf32>
    %108 = arith.addf %103, %107 : vector<16x128xf32>
    %cst_53 = arith.constant 0.797884583 : f32
    %109 = vector.broadcast %cst_53 : f32 to vector<16x128xf32>
    %110 = arith.mulf %109, %108 : vector<16x128xf32>
    %111 = math.tanh %110 : vector<16x128xf32>
    %cst_54 = arith.constant 1.000000e+00 : f32
    %112 = vector.broadcast %cst_54 : f32 to vector<16x128xf32>
    %113 = arith.addf %112, %111 : vector<16x128xf32>
    %cst_55 = arith.constant 5.000000e-01 : f32
    %114 = vector.broadcast %cst_55 : f32 to vector<16x128xf32>
    %115 = arith.mulf %114, %113 : vector<16x128xf32>
    %116 = arith.mulf %103, %115 : vector<16x128xf32>
    %117 = arith.truncf %116 : vector<16x128xf32> to vector<16x128xbf16>
    %c0_56 = arith.constant 0 : index
    %c0_57 = arith.constant 0 : index
    %c0_58 = arith.constant 0 : index
    %118 = vector.load %arg13[%c0_56, %c0_57, %c0_58] : memref<2x128x32xbf16, #tpu.memory_space<vmem>>, vector<1x128x32xbf16>
    %119 = vector.shape_cast %118 : vector<1x128x32xbf16> to vector<128x32xbf16>
    %cst_59 = arith.constant dense<0.000000e+00> : vector<16x32xf32>
    %120 = tpu.matmul %117, %119, %cst_59 {dimension_numbers = #tpu.dot_dimension_numbers<[1], [0], [0], [1], [0, 0, 1, 1], [], []>} : vector<16x128xbf16>, vector<128x32xbf16>, vector<16x32xf32> -> vector<16x32xf32>
    %c0_60 = arith.constant 0 : index
    %c0_61 = arith.constant 0 : index
    %c0_62 = arith.constant 0 : index
    %121 = vector.load %arg14[%c0_60, %c0_61, %c0_62] : memref<2x1x32xf32, #tpu.memory_space<vmem>>, vector<1x1x32xf32>
    %122 = vector.shape_cast %121 : vector<1x1x32xf32> to vector<1x32xf32>
    %123 = vector.broadcast %122 : vector<1x32xf32> to vector<16x32xf32>
    %124 = arith.addf %120, %123 : vector<16x32xf32>
    %125 = arith.addf %69, %124 : vector<16x32xf32>
    %c1 = arith.constant 1 : index
    %c0_63 = arith.constant 0 : index
    %c0_64 = arith.constant 0 : index
    %126 = vector.load %arg3[%c1, %c0_63, %c0_64] : memref<2x1x32xf32, #tpu.memory_space<vmem>>, vector<1x1x32xf32>
    %127 = vector.shape_cast %126 : vector<1x1x32xf32> to vector<1x32xf32>
    %c1_65 = arith.constant 1 : index
    %c0_66 = arith.constant 0 : index
    %c0_67 = arith.constant 0 : index
    %128 = vector.load %arg4[%c1_65, %c0_66, %c0_67] : memref<2x1x32xf32, #tpu.memory_space<vmem>>, vector<1x1x32xf32>
    %129 = vector.shape_cast %128 : vector<1x1x32xf32> to vector<1x32xf32>
    %cst_68 = arith.constant dense<0.000000e+00> : vector<16xf32>
    %130 = vector.multi_reduction <add>, %125, %cst_68 [1] : vector<16x32xf32> to vector<16xf32>
    %131 = vector.shape_cast %130 : vector<16xf32> to vector<16x1xf32>
    %cst_69 = arith.constant 3.200000e+01 : f32
    %132 = vector.broadcast %cst_69 : f32 to vector<16x1xf32>
    %133 = arith.divf %131, %132 : vector<16x1xf32>
    %134 = vector.broadcast %133 : vector<16x1xf32> to vector<16x32xf32>
    %135 = arith.subf %125, %134 : vector<16x32xf32>
    %136 = arith.mulf %135, %135 : vector<16x32xf32>
    %cst_70 = arith.constant dense<0.000000e+00> : vector<16xf32>
    %137 = vector.multi_reduction <add>, %136, %cst_70 [1] : vector<16x32xf32> to vector<16xf32>
    %138 = vector.shape_cast %137 : vector<16xf32> to vector<16x1xf32>
    %cst_71 = arith.constant 3.200000e+01 : f32
    %139 = vector.broadcast %cst_71 : f32 to vector<16x1xf32>
    %140 = arith.divf %138, %139 : vector<16x1xf32>
    %141 = vector.broadcast %133 : vector<16x1xf32> to vector<16x32xf32>
    %142 = arith.subf %125, %141 : vector<16x32xf32>
    %cst_72 = arith.constant 9.99999974E-6 : f32
    %143 = vector.broadcast %cst_72 : f32 to vector<16x1xf32>
    %144 = arith.addf %140, %143 : vector<16x1xf32>
    %145 = math.rsqrt %144 : vector<16x1xf32>
    %146 = vector.broadcast %145 : vector<16x1xf32> to vector<16x32xf32>
    %147 = arith.mulf %142, %146 : vector<16x32xf32>
    %148 = vector.broadcast %127 : vector<1x32xf32> to vector<16x32xf32>
    %149 = arith.mulf %147, %148 : vector<16x32xf32>
    %150 = vector.broadcast %129 : vector<1x32xf32> to vector<16x32xf32>
    %151 = arith.addf %149, %150 : vector<16x32xf32>
    %152 = arith.truncf %151 : vector<16x32xf32> to vector<16x32xbf16>
    %c1_73 = arith.constant 1 : index
    %c0_74 = arith.constant 0 : index
    %c0_75 = arith.constant 0 : index
    %153 = vector.load %arg5[%c1_73, %c0_74, %c0_75] : memref<2x32x96xbf16, #tpu.memory_space<vmem>>, vector<1x32x96xbf16>
    %154 = vector.shape_cast %153 : vector<1x32x96xbf16> to vector<32x96xbf16>
    %cst_76 = arith.constant dense<0.000000e+00> : vector<16x96xf32>
    %155 = tpu.matmul %152, %154, %cst_76 {dimension_numbers = #tpu.dot_dimension_numbers<[1], [0], [0], [1], [0, 0, 1, 1], [], []>} : vector<16x32xbf16>, vector<32x96xbf16>, vector<16x96xf32> -> vector<16x96xf32>
    %c1_77 = arith.constant 1 : index
    %c0_78 = arith.constant 0 : index
    %c0_79 = arith.constant 0 : index
    %156 = vector.load %arg6[%c1_77, %c0_78, %c0_79] : memref<2x1x96xf32, #tpu.memory_space<vmem>>, vector<1x1x96xf32>
    %157 = vector.shape_cast %156 : vector<1x1x96xf32> to vector<1x96xf32>
    %158 = vector.broadcast %157 : vector<1x96xf32> to vector<16x96xf32>
    %159 = arith.addf %155, %158 : vector<16x96xf32>
    %160 = vector.extract_strided_slice %159 {offsets = [0, 0], sizes = [16, 32], strides = [1, 1]} : vector<16x96xf32> to vector<16x32xf32>
    %161 = vector.extract_strided_slice %159 {offsets = [0, 32], sizes = [16, 32], strides = [1, 1]} : vector<16x96xf32> to vector<16x32xf32>
    %162 = vector.extract_strided_slice %159 {offsets = [0, 64], sizes = [16, 32], strides = [1, 1]} : vector<16x96xf32> to vector<16x32xf32>
    %163 = tpu.concatenate %161, %161, %161, %161 in 0 : vector<16x32xf32>, vector<16x32xf32>, vector<16x32xf32>, vector<16x32xf32> -> vector<64x32xf32>
    %164 = arith.mulf %163, %2 : vector<64x32xf32>
    %165 = arith.truncf %164 : vector<64x32xf32> to vector<64x32xbf16>
    %166 = tpu.concatenate %162, %162, %162, %162 in 0 : vector<16x32xf32>, vector<16x32xf32>, vector<16x32xf32>, vector<16x32xf32> -> vector<64x32xf32>
    %167 = arith.mulf %166, %2 : vector<64x32xf32>
    %168 = arith.truncf %167 : vector<64x32xf32> to vector<64x32xbf16>
    %169 = arith.truncf %160 : vector<16x32xf32> to vector<16x32xbf16>
    "tpu.trace_start"() <{level = 10 : i32, message = "nc,rc->nr"}> : () -> ()
    %cst_80 = arith.constant dense<0.000000e+00> : vector<16x64xf32>
    %170 = tpu.matmul %169, %165, %cst_80 {dimension_numbers = #tpu.dot_dimension_numbers<[1], [1], [0], [0], [0, 0, 1, 0], [], []>} : vector<16x32xbf16>, vector<64x32xbf16>, vector<16x64xf32> -> vector<16x64xf32>
    "tpu.trace_stop"() : () -> ()
    %171 = arith.addf %170, %1 : vector<16x64xf32>
    %cst_81 = arith.constant dense<0xFF800000> : vector<16xf32>
    %172 = vector.multi_reduction <maximumf>, %171, %cst_81 [1] : vector<16x64xf32> to vector<16xf32>
    %173 = vector.shape_cast %172 : vector<16xf32> to vector<16x1xf32>
    %174 = vector.broadcast %173 : vector<16x1xf32> to vector<16x64xf32>
    %175 = arith.subf %171, %174 : vector<16x64xf32>
    %176 = math.exp %175 : vector<16x64xf32>
    %cst_82 = arith.constant dense<0.000000e+00> : vector<16x32xf32>
    %177 = tpu.matmul %176, %2, %cst_82 {dimension_numbers = #tpu.dot_dimension_numbers<[1], [0], [0], [1], [0, 0, 1, 1], [], []>} : vector<16x64xf32>, vector<64x32xf32>, vector<16x32xf32> -> vector<16x32xf32>
    %cst_83 = arith.constant 1.000000e-30 : f32
    %178 = vector.broadcast %cst_83 : f32 to vector<16x32xf32>
    %179 = arith.maximumf %177, %178 : vector<16x32xf32>
    %180 = arith.truncf %176 : vector<16x64xf32> to vector<16x64xbf16>
    %cst_84 = arith.constant dense<0.000000e+00> : vector<16x32xf32>
    %181 = tpu.matmul %180, %168, %cst_84 {dimension_numbers = #tpu.dot_dimension_numbers<[1], [0], [0], [1], [0, 0, 1, 1], [], []>} : vector<16x64xbf16>, vector<64x32xbf16>, vector<16x32xf32> -> vector<16x32xf32>
    %182 = tpu.reciprocal %179 {approx = true} : vector<16x32xf32> -> vector<16x32xf32>
    %183 = arith.mulf %181, %182 : vector<16x32xf32>
    %184 = arith.truncf %183 : vector<16x32xf32> to vector<16x32xbf16>
    %c1_85 = arith.constant 1 : index
    %c0_86 = arith.constant 0 : index
    %c0_87 = arith.constant 0 : index
    %185 = vector.load %arg7[%c1_85, %c0_86, %c0_87] : memref<2x32x32xbf16, #tpu.memory_space<vmem>>, vector<1x32x32xbf16>
    %186 = vector.shape_cast %185 : vector<1x32x32xbf16> to vector<32x32xbf16>
    %cst_88 = arith.constant dense<0.000000e+00> : vector<16x32xf32>
    %187 = tpu.matmul %184, %186, %cst_88 {dimension_numbers = #tpu.dot_dimension_numbers<[1], [0], [0], [1], [0, 0, 1, 1], [], []>} : vector<16x32xbf16>, vector<32x32xbf16>, vector<16x32xf32> -> vector<16x32xf32>
    %c1_89 = arith.constant 1 : index
    %c0_90 = arith.constant 0 : index
    %c0_91 = arith.constant 0 : index
    %188 = vector.load %arg8[%c1_89, %c0_90, %c0_91] : memref<2x1x32xf32, #tpu.memory_space<vmem>>, vector<1x1x32xf32>
    %189 = vector.shape_cast %188 : vector<1x1x32xf32> to vector<1x32xf32>
    %190 = vector.broadcast %189 : vector<1x32xf32> to vector<16x32xf32>
    %191 = arith.addf %187, %190 : vector<16x32xf32>
    %192 = arith.addf %125, %191 : vector<16x32xf32>
    %c1_92 = arith.constant 1 : index
    %c0_93 = arith.constant 0 : index
    %c0_94 = arith.constant 0 : index
    %193 = vector.load %arg9[%c1_92, %c0_93, %c0_94] : memref<2x1x32xf32, #tpu.memory_space<vmem>>, vector<1x1x32xf32>
    %194 = vector.shape_cast %193 : vector<1x1x32xf32> to vector<1x32xf32>
    %c1_95 = arith.constant 1 : index
    %c0_96 = arith.constant 0 : index
    %c0_97 = arith.constant 0 : index
    %195 = vector.load %arg10[%c1_95, %c0_96, %c0_97] : memref<2x1x32xf32, #tpu.memory_space<vmem>>, vector<1x1x32xf32>
    %196 = vector.shape_cast %195 : vector<1x1x32xf32> to vector<1x32xf32>
    %cst_98 = arith.constant dense<0.000000e+00> : vector<16xf32>
    %197 = vector.multi_reduction <add>, %192, %cst_98 [1] : vector<16x32xf32> to vector<16xf32>
    %198 = vector.shape_cast %197 : vector<16xf32> to vector<16x1xf32>
    %cst_99 = arith.constant 3.200000e+01 : f32
    %199 = vector.broadcast %cst_99 : f32 to vector<16x1xf32>
    %200 = arith.divf %198, %199 : vector<16x1xf32>
    %201 = vector.broadcast %200 : vector<16x1xf32> to vector<16x32xf32>
    %202 = arith.subf %192, %201 : vector<16x32xf32>
    %203 = arith.mulf %202, %202 : vector<16x32xf32>
    %cst_100 = arith.constant dense<0.000000e+00> : vector<16xf32>
    %204 = vector.multi_reduction <add>, %203, %cst_100 [1] : vector<16x32xf32> to vector<16xf32>
    %205 = vector.shape_cast %204 : vector<16xf32> to vector<16x1xf32>
    %cst_101 = arith.constant 3.200000e+01 : f32
    %206 = vector.broadcast %cst_101 : f32 to vector<16x1xf32>
    %207 = arith.divf %205, %206 : vector<16x1xf32>
    %208 = vector.broadcast %200 : vector<16x1xf32> to vector<16x32xf32>
    %209 = arith.subf %192, %208 : vector<16x32xf32>
    %cst_102 = arith.constant 9.99999974E-6 : f32
    %210 = vector.broadcast %cst_102 : f32 to vector<16x1xf32>
    %211 = arith.addf %207, %210 : vector<16x1xf32>
    %212 = math.rsqrt %211 : vector<16x1xf32>
    %213 = vector.broadcast %212 : vector<16x1xf32> to vector<16x32xf32>
    %214 = arith.mulf %209, %213 : vector<16x32xf32>
    %215 = vector.broadcast %194 : vector<1x32xf32> to vector<16x32xf32>
    %216 = arith.mulf %214, %215 : vector<16x32xf32>
    %217 = vector.broadcast %196 : vector<1x32xf32> to vector<16x32xf32>
    %218 = arith.addf %216, %217 : vector<16x32xf32>
    %219 = arith.truncf %218 : vector<16x32xf32> to vector<16x32xbf16>
    %c1_103 = arith.constant 1 : index
    %c0_104 = arith.constant 0 : index
    %c0_105 = arith.constant 0 : index
    %220 = vector.load %arg11[%c1_103, %c0_104, %c0_105] : memref<2x32x128xbf16, #tpu.memory_space<vmem>>, vector<1x32x128xbf16>
    %221 = vector.shape_cast %220 : vector<1x32x128xbf16> to vector<32x128xbf16>
    %cst_106 = arith.constant dense<0.000000e+00> : vector<16x128xf32>
    %222 = tpu.matmul %219, %221, %cst_106 {dimension_numbers = #tpu.dot_dimension_numbers<[1], [0], [0], [1], [0, 0, 1, 1], [], []>} : vector<16x32xbf16>, vector<32x128xbf16>, vector<16x128xf32> -> vector<16x128xf32>
    %c1_107 = arith.constant 1 : index
    %c0_108 = arith.constant 0 : index
    %c0_109 = arith.constant 0 : index
    %223 = vector.load %arg12[%c1_107, %c0_108, %c0_109] : memref<2x1x128xf32, #tpu.memory_space<vmem>>, vector<1x1x128xf32>
    %224 = vector.shape_cast %223 : vector<1x1x128xf32> to vector<1x128xf32>
    %225 = vector.broadcast %224 : vector<1x128xf32> to vector<16x128xf32>
    %226 = arith.addf %222, %225 : vector<16x128xf32>
    %227 = arith.mulf %226, %226 : vector<16x128xf32>
    %228 = arith.mulf %226, %227 : vector<16x128xf32>
    %cst_110 = arith.constant 4.471500e-02 : f32
    %229 = vector.broadcast %cst_110 : f32 to vector<16x128xf32>
    %230 = arith.mulf %229, %228 : vector<16x128xf32>
    %231 = arith.addf %226, %230 : vector<16x128xf32>
    %cst_111 = arith.constant 0.797884583 : f32
    %232 = vector.broadcast %cst_111 : f32 to vector<16x128xf32>
    %233 = arith.mulf %232, %231 : vector<16x128xf32>
    %234 = math.tanh %233 : vector<16x128xf32>
    %cst_112 = arith.constant 1.000000e+00 : f32
    %235 = vector.broadcast %cst_112 : f32 to vector<16x128xf32>
    %236 = arith.addf %235, %234 : vector<16x128xf32>
    %cst_113 = arith.constant 5.000000e-01 : f32
    %237 = vector.broadcast %cst_113 : f32 to vector<16x128xf32>
    %238 = arith.mulf %237, %236 : vector<16x128xf32>
    %239 = arith.mulf %226, %238 : vector<16x128xf32>
    %240 = arith.truncf %239 : vector<16x128xf32> to vector<16x128xbf16>
    %c1_114 = arith.constant 1 : index
    %c0_115 = arith.constant 0 : index
    %c0_116 = arith.constant 0 : index
    %241 = vector.load %arg13[%c1_114, %c0_115, %c0_116] : memref<2x128x32xbf16, #tpu.memory_space<vmem>>, vector<1x128x32xbf16>
    %242 = vector.shape_cast %241 : vector<1x128x32xbf16> to vector<128x32xbf16>
    %cst_117 = arith.constant dense<0.000000e+00> : vector<16x32xf32>
    %243 = tpu.matmul %240, %242, %cst_117 {dimension_numbers = #tpu.dot_dimension_numbers<[1], [0], [0], [1], [0, 0, 1, 1], [], []>} : vector<16x128xbf16>, vector<128x32xbf16>, vector<16x32xf32> -> vector<16x32xf32>
    %c1_118 = arith.constant 1 : index
    %c0_119 = arith.constant 0 : index
    %c0_120 = arith.constant 0 : index
    %244 = vector.load %arg14[%c1_118, %c0_119, %c0_120] : memref<2x1x32xf32, #tpu.memory_space<vmem>>, vector<1x1x32xf32>
    %245 = vector.shape_cast %244 : vector<1x1x32xf32> to vector<1x32xf32>
    %246 = vector.broadcast %245 : vector<1x32xf32> to vector<16x32xf32>
    %247 = arith.addf %243, %246 : vector<16x32xf32>
    %248 = arith.addf %192, %247 : vector<16x32xf32>
    %c0_121 = arith.constant 0 : index
    %c0_122 = arith.constant 0 : index
    %249 = vector.load %arg15[%c0_121, %c0_122] : memref<1x32xf32, #tpu.memory_space<vmem>>, vector<1x32xf32>
    %c0_123 = arith.constant 0 : index
    %c0_124 = arith.constant 0 : index
    %250 = vector.load %arg16[%c0_123, %c0_124] : memref<1x32xf32, #tpu.memory_space<vmem>>, vector<1x32xf32>
    %cst_125 = arith.constant dense<0.000000e+00> : vector<16xf32>
    %251 = vector.multi_reduction <add>, %248, %cst_125 [1] : vector<16x32xf32> to vector<16xf32>
    %252 = vector.shape_cast %251 : vector<16xf32> to vector<16x1xf32>
    %cst_126 = arith.constant 3.200000e+01 : f32
    %253 = vector.broadcast %cst_126 : f32 to vector<16x1xf32>
    %254 = arith.divf %252, %253 : vector<16x1xf32>
    %255 = vector.broadcast %254 : vector<16x1xf32> to vector<16x32xf32>
    %256 = arith.subf %248, %255 : vector<16x32xf32>
    %257 = arith.mulf %256, %256 : vector<16x32xf32>
    %cst_127 = arith.constant dense<0.000000e+00> : vector<16xf32>
    %258 = vector.multi_reduction <add>, %257, %cst_127 [1] : vector<16x32xf32> to vector<16xf32>
    %259 = vector.shape_cast %258 : vector<16xf32> to vector<16x1xf32>
    %cst_128 = arith.constant 3.200000e+01 : f32
    %260 = vector.broadcast %cst_128 : f32 to vector<16x1xf32>
    %261 = arith.divf %259, %260 : vector<16x1xf32>
    %262 = vector.broadcast %254 : vector<16x1xf32> to vector<16x32xf32>
    %263 = arith.subf %248, %262 : vector<16x32xf32>
    %cst_129 = arith.constant 9.99999974E-6 : f32
    %264 = vector.broadcast %cst_129 : f32 to vector<16x1xf32>
    %265 = arith.addf %261, %264 : vector<16x1xf32>
    %266 = math.rsqrt %265 : vector<16x1xf32>
    %267 = vector.broadcast %266 : vector<16x1xf32> to vector<16x32xf32>
    %268 = arith.mulf %263, %267 : vector<16x32xf32>
    %269 = vector.broadcast %249 : vector<1x32xf32> to vector<16x32xf32>
    %270 = arith.mulf %268, %269 : vector<16x32xf32>
    %271 = vector.broadcast %250 : vector<1x32xf32> to vector<16x32xf32>
    %272 = arith.addf %270, %271 : vector<16x32xf32>
    %c0_130 = arith.constant 0 : index
    %c0_131 = arith.constant 0 : index
    %273 = vector.load %arg17[%c0_130, %c0_131] : memref<16x32xf32, #tpu.memory_space<vmem>>, vector<16x32xf32>
    tpu.vector_store %arg17[%c0_130, %c0_131], %272 {strides = array<i32>} : memref<16x32xf32, #tpu.memory_space<vmem>>, vector<16x32xf32>,
    return
  }
}

</mosaic_0001>

<bundles_post_ra>
// kernel: tpu_custom_call.1
= control target key start
LH: loop header
LB: loop body
LE: loop exit
PB: predicated region body
PF: predicated region fallthrough
CT: control target
= control target key end

     0   :  { %s2667_s0 = inlined_call_operand.vmem [shape: f32[16,32], index: 0, kind: input, shape index: {}]   ;;  %s2668_s1 = inlined_call_operand.vmem [shape: f32[16,64], index: 1, kind: input, shape index: {}]   ;;  %s2669_s2 = inlined_call_operand.vmem [shape: f32[64,32], index: 2, kind: input, shape index: {}]   ;;  %s2670_s3 = inlined_call_operand.vmem [shape: f32[2,1,32], index: 3, kind: input, shape index: {}]   ;;  %s2671_s4 = inlined_call_operand.vmem [shape: f32[2,1,32], index: 4, kind: input, shape index: {}]   ;;  %s2672_s5 = inlined_call_operand.vmem [shape: bf16[2,32,96], index: 5, kind: input, shape index: {}]   ;;  %s2673_s6 = inlined_call_operand.vmem [shape: f32[2,1,96], index: 6, kind: input, shape index: {}]   ;;  %s2674_s7 = inlined_call_operand.vmem [shape: bf16[2,32,32], index: 7, kind: input, shape index: {}]   ;;  %s2675_s8 = inlined_call_operand.vmem [shape: f32[2,1,32], index: 8, kind: input, shape index: {}]   ;;  %s2676_s9 = inlined_call_operand.vmem [shape: f32[2,1,32], index: 9, kind: input, shape index: {}]   ;;  %s2677_s10 = inlined_call_operand.vmem [shape: f32[2,1,32], index: 10, kind: input, shape index: {}]   ;;  %s2678_s11 = inlined_call_operand.vmem [shape: bf16[2,32,128], index: 11, kind: input, shape index: {}]   ;;  %s2679_s12 = inlined_call_operand.vmem [shape: f32[2,1,128], index: 12, kind: input, shape index: {}]   ;;  %s2680_s13 = inlined_call_operand.vmem [shape: bf16[2,128,32], index: 13, kind: input, shape index: {}]   ;;  %s2681_s14 = inlined_call_operand.vmem [shape: f32[2,1,32], index: 14, kind: input, shape index: {}]   ;;  %s2682_s15 = inlined_call_operand.vmem [shape: f32[1,32], index: 15, kind: input, shape index: {}]   ;;  %s2683_s16 = inlined_call_operand.vmem [shape: f32[1,32], index: 16, kind: input, shape index: {}]   ;;  %s2684_s17 = inlined_call_operand.hbm [shape: f32[16,32], index: 17, kind: output, shape index: {}]  }
   0x1   :  { %2687 = sst [smem:[#allocation5_spill]] %s2667_s0 }
   0x2   :  { %2688 = sst [smem:[#allocation6_spill]] %s2668_s1 }
   0x3   :  { %s2689_s26 = sld [smem:[#allocation5_spill]]  ;;  %vm72_vm0 = vcmask 261120  }
   0x9   :  { %v2146_v0 = vld [vmem:[%s2689_s26] sm:$0xff]  ;;  %v2151_v1 = vld [vmem:[%s2689_s26 + $0x8] sm:$0xff] }
   0xa   :  { %v73_v2 = vsel %vm72_vm0, %v2146_v0, 0.0  ;;  %v76_v3 = vsel %vm72_vm0, %v2151_v1, 0.0 }
   0xb   :  { %74 = vadd.xlane.f32.xlu0 %v73_v2 }
   0xf   :  { %77 = vadd.xlane.f32.xlu0 %v76_v3 }
  0x10   :  { %22 = vsyncpa [#allocation3], 0  ;;  %v1949_v14 = vld [vmem:[%s2672_s5] sm:$0xff]   ;;  %v2045_v15 = vmov 0.0   ;;  %v1950_v16 = vld [vmem:[%s2672_s5 + $0x8] sm:$0xff]   ;;  %vm2046_vm1 = vmmov 0  }
  0x11   :  { %1735 = vmatprep.subr.bf16.mxu0 %v2045_v15  ;;  %1743 = vmatprep.subr.bf16.mxu1 %v2045_v15  ;;  %v2178_v17 = vld [vmem:[%s2669_s2 + $0x8] sm:$0xff]  ;;  %v2183_v18 = vld [vmem:[%s2669_s2] sm:$0xff]  ;;  %s2047_s22 = smov 32   ;;  %v2190_v19 = vld [vmem:[%s2669_s2 + $0x10] sm:$0xff]  ;;  %s2048_s25 = smov 96   ;;  %vm333_vm2 = vcmask 523264  }
  0x12   :  { %1736 = vmatpush3.bf16.msra.mxu0 %v1949_v14  ;;  %1739 = vmatprep.mubr.msk.bf16.mxu0 %vm2046_vm1, %v2045_v15  ;;  %v2195_v20 = vld [vmem:[%s2669_s2 + $0x20] sm:$0xff]  ;;  %v2202_v21 = vld [vmem:[%s2669_s2 + $0x18] sm:$0xff]  ;;  %v2207_v22 = vld [vmem:[%s2669_s2 + $0x30] sm:$0xff]  ;;  %s2049_s26 = smov 64   ;;  %v2299_v14 = vpack.c.bf16 %v2178_v17, %v2183_v18  ;;  %s2690_s29 = sld [smem:[#allocation6_spill]] }
  0x13   :  { %1737 = vmatprep.subr.bf16.mxu0 %v2045_v15  ;;  %1751 = vmatprep.mubr.msk.bf16.mxu1 %vm2046_vm1, %v2045_v15  ;;  %v2214_v23 = vld [vmem:[%s2669_s2 + $0x28] sm:$0xff]  ;;  %v2220_v24 = vld [vmem:[%s2669_s2 + $0x38] sm:$0xff]  ;;  %v1563_v33 = vld [vmem:[%s2670_s3] ss:$0 sm:$0xff]  ;;  %s2050_s21 = smov [#allocation2]  }
  0x14   :  { %v1564_v37 = vld [vmem:[%s2671_s4] ss:$0 sm:$0xff]  ;;  %s1552_s2 = sshll.u32 %s2050_s21, 4  ;;  %s1553_s2 = int_to_ptr.vmem [resolvable:$true] %s1552_s2 }
  0x15   :  { %v1565_v46 = vld [vmem:[%s2673_s6] ss:$0 sm:$0xff]  ;;  %p2026_p1 = scmp.lt.s32.totalorder %s1553_s2, %s1553_s2 }
  0x16   :  { %1738 = vmatpush3.bf16.msra.mxu0 %v1950_v16 }
  0x17   :  { %1774 = vmatprep.subr.bf16.mxu0 %v2045_v15 }
  0x25   :  { %192 = vrot.lane.b32.xlu0 %v2183_v18, %s2047_s22 }
  0x29   :  { %200 = vrot.lane.b32.xlu0 %v2195_v20, %s2047_s22 }
  0x2d   :  { %204 = vrot.lane.b32.xlu0 %v2207_v22, %s2047_s22 }
  0x98   :  { %v75_v4 = vpop.xlane.xlu0 %74 }
  0x99   :  { %v80_v5 = vmul.f32 0.03125, %v75_v4 }
  0x9b   :  { %v82_v6 = vsub.f32 %v2146_v0, %v80_v5 }
  0x9c   :  { %v78_v7 = vpop.xlane.xlu0 %77 }
  0x9d   :  { %v81_v8 = vmul.f32 0.03125, %v78_v7  ;;  %v84_v9 = vmul.f32 %v82_v6, %v82_v6 }
  0x9f   :  { %v83_v10 = vsub.f32 %v2151_v1, %v81_v8  ;;  %v86_v11 = vsel %vm72_vm0, %v84_v9, 0.0 }
  0xa0   :  { %87 = vadd.xlane.f32.xlu1 %v86_v11  ;;  %v2238_v45 = vpop.permute.xlu0 %192 }
  0xa1   :  { %v85_v12 = vmul.f32 %v83_v10, %v83_v10 }
  0xa3   :  { %v89_v13 = vsel %vm72_vm0, %v85_v12, 0.0 }
  0xa4   :  { %90 = vadd.xlane.f32.xlu1 %v89_v13  ;;  %v2245_v48 = vpop.permute.xlu0 %200 }
  0xa8   :  { %v2261_v60 = vpop.permute.xlu0 %204 }
  0xb5   :  { %194 = vrot.lane.b32.xlu1 %v2178_v17, %s2047_s22 }
  0xb9   :  { %196 = vrot.lane.b32.xlu1 %v2190_v19, %s2047_s22 }
  0xbd   :  { %198 = vrot.lane.b32.xlu1 %v2202_v21, %s2047_s22 }
  0xc1   :  { %202 = vrot.lane.b32.xlu1 %v2214_v23, %s2047_s22 }
  0xc5   :  { %206 = vrot.lane.b32.xlu1 %v2220_v24, %s2047_s22 }
 0x12d   :  { %v88_v25 = vpop.xlane.xlu1 %87 }
 0x12e   :  { %v92_v26 = vmul.f32 0.03125, %v88_v25  ;;  %v2305_v25 = vpack.c.bf16 %v2202_v21, %v2190_v19 }
 0x130   :  { %v94_v27 = vadd.f32 1e-05, %v92_v26 }
 0x131   :  { %v91_v28 = vpop.xlane.xlu1 %90 }
 0x132   :  { %1977 = vrsqrt.f32 %v94_v27  ;;  %v93_v29 = vmul.f32 0.03125, %v91_v28 }
 0x134   :  { %v95_v30 = vadd.f32 1e-05, %v93_v29 }
 0x135   :  { %v2232_v42 = vpop.permute.xlu1 %194 }
 0x136   :  { %1979 = vrsqrt.f32 %v95_v30 }
 0x139   :  { %v2234_v43 = vpop.permute.xlu1 %196 }
 0x13c   :  { %v1978_v31 = vpop.eup %1977 }
 0x13d   :  { %v98_v32 = vmul.f32 %v1978_v31, %v82_v6  ;;  %v2236_v44 = vpop.permute.xlu1 %198 }
 0x13f   :  { %v106_v36 = vmul.f32 %v1563_v33, %v98_v32 }
 0x140   :  { %v1980_v34 = vpop.eup %1979 }
 0x141   :  { %v99_v35 = vmul.f32 %v1980_v34, %v83_v10  ;;  %v114_v39 = vadd.f32 %v1564_v37, %v106_v36  ;;  %v2243_v47 = vpop.permute.xlu1 %202 }
 0x143   :  { %v107_v38 = vmul.f32 %v1563_v33, %v99_v35 }
 0x145   :  { %v115_v40 = vadd.f32 %v1564_v37, %v107_v38  ;;  %v2251_v55 = vpop.permute.xlu1 %206 }
 0x147   :  { %v116_v41 = vpack.c.bf16 %v115_v40, %v114_v39 }
 0x149   :  { %1740 = vmatmul.mubr.msk.bf16.vlgmr.msra.gmra.mrb[0].mxu0 %vm72_vm0, %v116_v41 }
 0x14a   :  { %1782 = vmatprep.mubr.msk.bf16.mxu0 %vm2046_vm1, %v2045_v15 }
 0x21c   :  { %v177_v49 = vpop.f32.mrb[0].mxu0 }
 0x21d   :  { %v2247_v50 = vadd.f32 %v1565_v46, %v177_v49  ;;  %v1741_v51 = vpop.f32.mrb[1].mxu0 }
 0x21e   :  { %v180_v52 = vpop.f32.mrb[2].mxu0 }
 0x21f   :  { %v2249_v53 = vadd.f32 %v1565_v46, %v180_v52  ;;  %v1742_v54 = vpop.f32.mrb[3].mxu0  ;;  %v218_v56 = vmul.f32 %v2234_v43, %v2247_v50  ;;  %v216_v58 = vmul.f32 %v2238_v45, %v2247_v50  ;;  %v222_v3 = vmul.f32 %v2261_v60, %v2247_v50 }
 0x220   :  { %v220_v4 = vmul.f32 %v2245_v48, %v2247_v50 }
 0x221   :  { %v219_v57 = vmul.f32 %v2236_v44, %v2249_v53  ;;  %v217_v59 = vmul.f32 %v2232_v42, %v2249_v53  ;;  %v223_v61 = vmul.f32 %v2251_v55, %v2249_v53  ;;  %v221_v2 = vmul.f32 %v2243_v47, %v2249_v53 }
 0x222   :  { %v264_v26 = vpack.c.bf16 %v2249_v53, %v2247_v50 }
 0x223   :  { %v225_v62 = vpack.c.bf16 %v219_v57, %v218_v56  ;;  %v224_v63 = vpack.c.bf16 %v217_v59, %v216_v58  ;;  %v227_v5 = vpack.c.bf16 %v223_v61, %v222_v3  ;;  %v226_v6 = vpack.c.bf16 %v221_v2, %v220_v4 }
 0x225   :  { %271 = vrot.lane.b32.xlu1 %v225_v62, %s2048_s25  ;;  %269 = vrot.lane.b32.xlu0 %v224_v63, %s2048_s25 }
 0x229   :  { %273 = vrot.lane.b32.xlu0 %v226_v6, %s2048_s25  ;;  %275 = vrot.lane.b32.xlu1 %v227_v5, %s2048_s25 }
 0x22d   :  { %228 = vrot.lane.b32.xlu0 %v2183_v18, %s2049_s26  ;;  %230 = vrot.lane.b32.xlu1 %v2178_v17, %s2049_s26  ;;  %v2313_v17 = vpack.c.bf16 %v2214_v23, %v2195_v20  ;;  %v2319_v18 = vpack.c.bf16 %v2220_v24, %v2207_v22 }
 0x231   :  { %232 = vrot.lane.b32.xlu0 %v2190_v19, %s2049_s26  ;;  %234 = vrot.lane.b32.xlu1 %v2202_v21, %s2049_s26  ;;  %v2329_v19 = vld [vmem:[%s2690_s29] sm:$0xff] }
 0x235   :  { %236 = vrot.lane.b32.xlu0 %v2195_v20, %s2049_s26  ;;  %238 = vrot.lane.b32.xlu1 %v2214_v23, %s2049_s26  ;;  %v2338_v23 = vld [vmem:[%s2690_s29 + $0x8] sm:$0xff] }
 0x239   :  { %240 = vrot.lane.b32.xlu0 %v2207_v22, %s2049_s26  ;;  %242 = vrot.lane.b32.xlu1 %v2220_v24, %s2049_s26 }
 0x297   :  { %v270_v7 = vpop.permute.xlu0 %269  ;;  %v272_v9 = vpop.permute.xlu1 %271 }
 0x298   :  { %v281_v8 = vsel %vm72_vm0, %v270_v7, 0  ;;  %v284_v10 = vsel %vm72_vm0, %v272_v9, 0 }
 0x299   :  { %1744 = vmatpush3.bf16.xpose.msra.mxu1 %v281_v8 }
 0x29a   :  { %1745 = vmatprep.subr.bf16.mxu1 %v2045_v15 }
 0x29b   :  { %v274_v11 = vpop.permute.xlu0 %273  ;;  %v276_v13 = vpop.permute.xlu1 %275 }
 0x29c   :  { %v287_v12 = vsel %vm72_vm0, %v274_v11, 0  ;;  %v290_v16 = vsel %vm72_vm0, %v276_v13, 0  ;;  %v1952_v11 = vld [vmem:[%s2674_s7 + $0x8] sm:$0xff]  }
 0x29f   :  { %v2331_v20 = vpop.permute.xlu1 %230  ;;  %v2333_v21 = vpop.permute.xlu0 %228 }
 0x2a0   :  { %v253_v41 = vmul.f32 %v2331_v20, %v2249_v53  ;;  %v252_v46 = vmul.f32 %v2333_v21, %v2247_v50 }
 0x2a1   :  { %1746 = vmatpush3.bf16.xpose.msra.mxu1 %v284_v10  ;;  %v1951_v10 = vld [vmem:[%s2674_s7] sm:$0xff]  }
 0x2a2   :  { %1747 = vmatprep.subr.bf16.mxu1 %v2045_v15  ;;  %v260_v54 = vpack.c.bf16 %v253_v41, %v252_v46 }
 0x2a3   :  { %v2344_v33 = vpop.permute.xlu1 %234  ;;  %v2346_v34 = vpop.permute.xlu0 %232 }
 0x2a4   :  { %v255_v37 = vmul.f32 %v2344_v33, %v2249_v53  ;;  %v254_v38 = vmul.f32 %v2346_v34, %v2247_v50 }
 0x2a6   :  { %v261_v49 = vpack.c.bf16 %v255_v37, %v254_v38  ;;  %v1573_v38 = vld [vmem:[%s2675_s8] ss:$0 sm:$0xff] }
 0x2a7   :  { %v2348_v35 = vpop.permute.xlu1 %238  ;;  %v2350_v36 = vpop.permute.xlu0 %236 }
 0x2a8   :  { %v257_v56 = vmul.f32 %v2348_v35, %v2249_v53  ;;  %v256_v57 = vmul.f32 %v2350_v36, %v2247_v50 }
 0x2a9   :  { %1748 = vmatpush3.bf16.xpose.msra.mxu1 %v287_v12 }
 0x2aa   :  { %1749 = vmatprep.subr.bf16.mxu1 %v2045_v15  ;;  %v262_v59 = vpack.c.bf16 %v257_v56, %v256_v57 }
 0x2ab   :  { %v2356_v39 = vpop.permute.xlu1 %242  ;;  %v2358_v40 = vpop.permute.xlu0 %240 }
 0x2ac   :  { %v259_v51 = vmul.f32 %v2356_v39, %v2249_v53  ;;  %v258_v52 = vmul.f32 %v2358_v40, %v2247_v50 }
 0x2ae   :  { %v263_v58 = vpack.c.bf16 %v259_v51, %v258_v52 }
 0x2b1   :  { %1750 = vmatpush3.bf16.xpose.msra.mxu1 %v290_v16 }
 0x2b2   :  { %1910 = vmatprep.subr.bf16.mxu1 %v2299_v14 }
 0x2b8   :  { %1752 = vmatmul.mubr.msk.bf16.vlgmr.msra.gmra.mrb[0].mxu1 %vm72_vm0, %v264_v26 }
 0x2b9   :  { %1912 = vmatpush3.bf16.msra.mxu1 %v2299_v14 }
 0x2ba   :  { %1914 = vmatprep.subr.bf16.mxu1 %v2305_v25 }
 0x2bd   :  { %1916 = vmatpush3.bf16.msra.mxu1 %v2305_v25 }
 0x2be   :  { %1918 = vmatprep.subr.bf16.mxu1 %v2313_v17 }
 0x2c1   :  { %1920 = vmatpush3.bf16.msra.mxu1 %v2313_v17 }
 0x2c2   :  { %1922 = vmatprep.subr.bf16.mxu1 %v2319_v18 }
 0x2c5   :  { %1924 = vmatpush3.bf16.msra.mxu1 %v2319_v18 }
 0x2c6   :  { %1786 = vmatprep.subr.bf16.mxu1 %v2045_v15 }
 0x38b   :  { %v326_v22 = vpop.f32.mrb[0].mxu1 }
 0x38c   :  { %v327_v24 = vadd.f32 %v326_v22, %v2329_v19  ;;  %v1753_v27 = vpop.f32.mrb[1].mxu1 }
 0x38d   :  { %v329_v28 = vpop.f32.mrb[2].mxu1 }
 0x38e   :  { %v330_v29 = vadd.f32 %v329_v28, %v2338_v23  ;;  %v1754_v30 = vpop.f32.mrb[3].mxu1  ;;  %v334_v31 = vsel %vm333_vm2, %v327_v24, -inf }
 0x38f   :  { %335 = vmax.xlane.f32.xlu0 %v334_v31 }
 0x390   :  { %v337_v32 = vsel %vm333_vm2, %v330_v29, -inf }
 0x391   :  { %338 = vmax.xlane.f32.xlu1 %v337_v32 }
 0x3a2   :  { %436 = vrot.lane.b32.xlu1 %v261_v49, %s2049_s26 }
 0x3a5   :  { %434 = vrot.lane.b32.xlu0 %v260_v54, %s2049_s26 }
 0x3a6   :  { %440 = vrot.lane.b32.xlu1 %v263_v58, %s2049_s26 }
 0x3a9   :  { %438 = vrot.lane.b32.xlu0 %v262_v59, %s2049_s26 }
 0x41c   :  { %v336_v61 = vpop.xlane.xlu0 %335 }
 0x41d   :  { %v340_v62 = vsub.f32 %v327_v24, %v336_v61 }
 0x41e   :  { %v339_v63 = vpop.xlane.xlu1 %338 }
 0x41f   :  { %v342_v2 = vmul.f32 1.442695, %v340_v62  ;;  %v341_v3 = vsub.f32 %v330_v29, %v339_v63 }
 0x420   :  { %v435_v4 = vpop.permute.xlu0 %434 }
 0x421   :  { %1981 = vpow2.f32 %v342_v2  ;;  %v344_v5 = vmul.f32 1.442695, %v341_v3  ;;  %1775 = vmatpush3.bf16.msra.mxu0 %v435_v4 }
 0x422   :  { %1776 = vmatprep.subr.bf16.mxu0 %v2045_v15  ;;  %v437_v50 = vpop.permute.xlu1 %436 }
 0x423   :  { %1983 = vpow2.f32 %v344_v5 }
 0x424   :  { %v439_v53 = vpop.permute.xlu0 %438 }
 0x425   :  { %1777 = vmatpush3.bf16.msra.mxu0 %v437_v50 }
 0x426   :  { %1778 = vmatprep.subr.bf16.mxu0 %v2045_v15  ;;  %v441_v7 = vpop.permute.xlu1 %440 }
 0x429   :  { %1779 = vmatpush3.bf16.msra.mxu0 %v439_v53  ;;  %v1953_v53 = vld [vmem:[%s2678_s11] sm:$0xff]  }
 0x42a   :  { %1780 = vmatprep.subr.bf16.mxu0 %v2045_v15 }
 0x42b   :  { %v1982_v6 = vpop.eup %1981 }
 0x42c   :  { %1771 = vmatprep.mubr.msk.f32.mxu1 %vm333_vm2, %v1982_v6 }
 0x42d   :  { %v1984_v8 = vpop.eup %1983  ;;  %1781 = vmatpush3.bf16.msra.mxu0 %v441_v7 }
 0x42e   :  { %1772 = vmatmul.mubr.msk.f32.vlgmr.msra.gmra.mrb[4].mxu1 %vm333_vm2, %v1984_v8  ;;  %v429_v9 = vpack.c.bf16 %v1984_v8, %v1982_v6  ;;  %1794 = vmatprep.subr.bf16.mxu0 %v2045_v15  ;;  %v1954_v6 = vld [vmem:[%s2678_s11 + $0x8] sm:$0xff]  }
 0x42f   :  { %1790 = vmatprep.mubr.msk.bf16.mxu1 %vm2046_vm1, %v2045_v15  ;;  %1787 = vmatpush3.bf16.msra.mxu1 %v1951_v10 }
 0x430   :  { %1783 = vmatmul.mubr.msk.bf16.vlgmr.msra.gmra.mrb[4].mxu0 %vm333_vm2, %v429_v9  ;;  %1788 = vmatprep.subr.bf16.mxu1 %v2045_v15 }
 0x431   :  { %1798 = vmatprep.mubr.msk.bf16.mxu0 %vm2046_vm1, %v2045_v15  ;;  %1795 = vmatpush3.bf16.msra.mxu0 %v1953_v53 }
 0x432   :  { %1796 = vmatprep.subr.bf16.mxu0 %v2045_v15 }
 0x433   :  { %1789 = vmatpush3.bf16.msra.mxu1 %v1952_v11 }
 0x434   :  { %1802 = vmatprep.subr.bf16.mxu1 %v2045_v15 }
 0x435   :  { %1797 = vmatpush3.bf16.msra.mxu0 %v1954_v6 }
 0x436   :  { %1822 = vmatprep.subr.bf16.mxu0 %v2045_v15 }
 0x501   :  { %v1773_v12 = vpop.f32.mrb[4].mxu1 }
 0x502   :  { %v428_v13 = vmax.f32 %v1773_v12, 1e-30  ;;  %v418_v16 = vpop.f32.mrb[5].mxu1 }
 0x503   :  { %v427_v26 = vmax.f32 %v418_v16, 1e-30  ;;  %v483_v22 = vpop.f32.mrb[4].mxu0 }
 0x504   :  { %1985 = vrcp.f32 %v428_v13  ;;  %v1784_v24 = vpop.f32.mrb[5].mxu0 }
 0x505   :  { %1987 = vrcp.f32 %v427_v26  ;;  %v486_v27 = vpop.f32.mrb[6].mxu0  ;;  %v1577_v26 = vld [vmem:[%s2676_s9] ss:$0 sm:$0xff] }
 0x506   :  { %v1785_v28 = vpop.f32.mrb[7].mxu0 }
 0x507   :  { %v1578_v28 = vld [vmem:[%s2677_s10] ss:$0 sm:$0xff] }
 0x50e   :  { %v1986_v29 = vpop.eup %1985 }
 0x50f   :  { %v1988_v30 = vpop.eup %1987  ;;  %v493_v31 = vmul.f32 %v1986_v29, %v486_v27 }
 0x510   :  { %v492_v32 = vmul.f32 %v1988_v30, %v483_v22 }
 0x512   :  { %v494_v37 = vpack.c.bf16 %v493_v31, %v492_v32 }
 0x514   :  { %1791 = vmatmul.mubr.msk.bf16.vlgmr.msra.gmra.mrb[8].mxu1 %vm72_vm0, %v494_v37  ;;  %v1955_v37 = vld [vmem:[%s2680_s13] sm:$0xff]  }
 0x515   :  { %1818 = vmatprep.mubr.msk.bf16.mxu1 %vm2046_vm1, %v2045_v15  ;;  %1803 = vmatpush3.bf16.msra.mxu1 %v1955_v37 }
 0x516   :  { %1804 = vmatprep.subr.bf16.mxu1 %v2045_v15 }
 0x5e7   :  { %v555_v41 = vpop.f32.mrb[8].mxu1 }
 0x5e8   :  { %v556_v46 = vadd.f32 %v1573_v38, %v555_v41  ;;  %v1792_v49 = vpop.f32.mrb[9].mxu1  ;;  %v1957_v41 = vld [vmem:[%s2680_s13 + $0x10] sm:$0xff]  }
 0x5e9   :  { %v558_v51 = vpop.f32.mrb[10].mxu1  ;;  %v1959_v49 = vld [vmem:[%s2680_s13 + $0x20] sm:$0xff]  }
 0x5ea   :  { %v2402_v52 = vadd.f32 %v556_v46, %v2146_v0  ;;  %v559_v54 = vadd.f32 %v1573_v38, %v558_v51  ;;  %v1793_v56 = vpop.f32.mrb[11].mxu1  ;;  %v1956_v38 = vld [vmem:[%s2680_s13 + $0x8] sm:$0xff]   ;;  %v1958_v46 = vld [vmem:[%s2680_s13 + $0x18] sm:$0xff]  }
 0x5eb   :  { %1805 = vmatpush3.bf16.msra.mxu1 %v1956_v38  ;;  %v1960_v51 = vld [vmem:[%s2680_s13 + $0x28] sm:$0xff]   ;;  %v1962_v56 = vld [vmem:[%s2680_s13 + $0x38] sm:$0xff]  }
 0x5ec   :  { %v2405_v57 = vadd.f32 %v559_v54, %v2151_v1  ;;  %v566_v58 = vsel %vm72_vm0, %v2402_v52, 0.0  ;;  %1806 = vmatprep.subr.bf16.mxu1 %v2045_v15  ;;  %v1961_v54 = vld [vmem:[%s2680_s13 + $0x30] sm:$0xff]  }
 0x5ed   :  { %567 = vadd.xlane.f32.xlu0 %v566_v58  ;;  %v1579_v58 = vld [vmem:[%s2679_s12] ss:$0 sm:$0xff] }
 0x5ee   :  { %v569_v59 = vsel %vm72_vm0, %v2405_v57, 0.0 }
 0x5ef   :  { %570 = vadd.xlane.f32.xlu1 %v569_v59  ;;  %1807 = vmatpush3.bf16.msra.mxu1 %v1957_v41 }
 0x5f0   :  { %1808 = vmatprep.subr.bf16.mxu1 %v2045_v15 }
 0x5f3   :  { %1809 = vmatpush3.bf16.msra.mxu1 %v1958_v46 }
 0x5f4   :  { %1810 = vmatprep.subr.bf16.mxu1 %v2045_v15 }
 0x5f7   :  { %1811 = vmatpush3.bf16.msra.mxu1 %v1959_v49 }
 0x5f8   :  { %1812 = vmatprep.subr.bf16.mxu1 %v2045_v15 }
 0x5fb   :  { %1813 = vmatpush3.bf16.msra.mxu1 %v1960_v51 }
 0x5fc   :  { %1814 = vmatprep.subr.bf16.mxu1 %v2045_v15 }
 0x5ff   :  { %1815 = vmatpush3.bf16.msra.mxu1 %v1961_v54 }
 0x600   :  { %1816 = vmatprep.subr.bf16.mxu1 %v2045_v15 }
 0x603   :  { %1817 = vmatpush3.bf16.msra.mxu1 %v1962_v56 }
 0x604   :  { %1926 = vmatprep.subr.bf16.mxu1 %v2299_v14 }
 0x67a   :  { %v568_v61 = vpop.xlane.xlu0 %567 }
 0x67b   :  { %v572_v62 = vmul.f32 0.03125, %v568_v61 }
 0x67c   :  { %v571_v63 = vpop.xlane.xlu1 %570 }
 0x67d   :  { %v574_v2 = vsub.f32 %v2402_v52, %v572_v62  ;;  %v573_v0 = vmul.f32 0.03125, %v571_v63 }
 0x67f   :  { %v575_v3 = vsub.f32 %v2405_v57, %v573_v0  ;;  %v576_v4 = vmul.f32 %v574_v2, %v574_v2 }
 0x681   :  { %v578_v1 = vsel %vm72_vm0, %v576_v4, 0.0  ;;  %v577_v5 = vmul.f32 %v575_v3, %v575_v3 }
 0x682   :  { %579 = vadd.xlane.f32.xlu0 %v578_v1 }
 0x683   :  { %v581_v50 = vsel %vm72_vm0, %v577_v5, 0.0 }
 0x686   :  { %582 = vadd.xlane.f32.xlu0 %v581_v50 }
 0x70f   :  { %v580_v7 = vpop.xlane.xlu0 %579 }
 0x710   :  { %v584_v8 = vmul.f32 0.03125, %v580_v7 }
 0x712   :  { %v586_v9 = vadd.f32 1e-05, %v584_v8 }
 0x713   :  { %v583_v10 = vpop.xlane.xlu0 %582 }
 0x714   :  { %1989 = vrsqrt.f32 %v586_v9  ;;  %v585_v11 = vmul.f32 0.03125, %v583_v10 }
 0x716   :  { %v587_v12 = vadd.f32 1e-05, %v585_v11 }
 0x718   :  { %1991 = vrsqrt.f32 %v587_v12 }
 0x71e   :  { %v1990_v13 = vpop.eup %1989 }
 0x71f   :  { %v590_v16 = vmul.f32 %v1990_v13, %v574_v2 }
 0x721   :  { %v598_v24 = vmul.f32 %v1577_v26, %v590_v16 }
 0x722   :  { %v1992_v22 = vpop.eup %1991 }
 0x723   :  { %v591_v27 = vmul.f32 %v1992_v22, %v575_v3  ;;  %v606_v30 = vadd.f32 %v1578_v28, %v598_v24 }
 0x725   :  { %v599_v29 = vmul.f32 %v1577_v26, %v591_v27 }
 0x727   :  { %v607_v31 = vadd.f32 %v1578_v28, %v599_v29  ;;  %v1583_v28 = vld [vmem:[%s2681_s14] ss:$0 sm:$0xff] }
 0x729   :  { %v608_v32 = vpack.c.bf16 %v607_v31, %v606_v30 }
 0x72b   :  { %1799 = vmatmul.mubr.msk.bf16.vlgmr.msra.gmra.mrb[8].mxu0 %vm72_vm0, %v608_v32 }
 0x72c   :  { %1826 = vmatprep.mubr.msk.bf16.mxu0 %vm2046_vm1, %v2045_v15 }
 0x7fe   :  { %v669_v59 = vpop.f32.mrb[8].mxu0 }
 0x7ff   :  { %v670_v61 = vadd.f32 %v1579_v58, %v669_v59  ;;  %v1800_v62 = vpop.f32.mrb[9].mxu0 }
 0x800   :  { %v672_v63 = vpop.f32.mrb[10].mxu0  ;;  %v1964_v62 = vld [vmem:[%s2672_s5 + $0x18] sm:$0xff]  }
 0x801   :  { %v676_v2 = vmul.f32 %v670_v61, %v670_v61  ;;  %v673_v0 = vadd.f32 %v1579_v58, %v672_v63  ;;  %v1801_v3 = vpop.f32.mrb[11].mxu0 }
 0x803   :  { %v678_v4 = vmul.f32 %v676_v2, %v670_v61  ;;  %v677_v1 = vmul.f32 %v673_v0, %v673_v0 }
 0x805   :  { %v680_v5 = vmul.f32 0.044715, %v678_v4  ;;  %v679_v50 = vmul.f32 %v677_v1, %v673_v0 }
 0x807   :  { %v682_v53 = vadd.f32 %v680_v5, %v670_v61  ;;  %v681_v6 = vmul.f32 0.044715, %v679_v50  ;;  %v1594_v50 = vld [vmem:[%s2670_s3 + $0x1] ss:$0 sm:$0xff] }
 0x809   :  { %v684_v7 = vmul.f32 0.7978846, %v682_v53  ;;  %v683_v8 = vadd.f32 %v681_v6, %v673_v0 }
 0x80b   :  { %1993 = vtanh.f32 %v684_v7  ;;  %v685_v9 = vmul.f32 0.7978846, %v683_v8 }
 0x80d   :  { %1995 = vtanh.f32 %v685_v9  ;;  %v1595_v9 = vld [vmem:[%s2671_s4 + $0x1] ss:$0 sm:$0xff] }
 0x815   :  { %v1994_v10 = vpop.eup %1993 }
 0x816   :  { %v688_v11 = vadd.f32 1.0, %v1994_v10 }
 0x817   :  { %v1996_v12 = vpop.eup %1995 }
 0x818   :  { %v690_v13 = vmul.f32 0.5, %v688_v11  ;;  %v689_v16 = vadd.f32 1.0, %v1996_v12 }
 0x81a   :  { %v691_v26 = vmul.f32 0.5, %v689_v16  ;;  %v692_v22 = vmul.f32 %v690_v13, %v670_v61  ;;  %v1963_v61 = vld [vmem:[%s2672_s5 + $0x10] sm:$0xff]   ;;  %v1601_v16 = vld [vmem:[%s2673_s6 + $0x1] ss:$0 sm:$0xff] }
 0x81b   :  { %1823 = vmatpush3.bf16.msra.mxu0 %v1963_v61 }
 0x81c   :  { %v693_v24 = vmul.f32 %v691_v26, %v673_v0  ;;  %1824 = vmatprep.subr.bf16.mxu0 %v2045_v15 }
 0x81e   :  { %v694_v27 = vpack.c.bf16 %v693_v24, %v692_v22 }
 0x81f   :  { %1825 = vmatpush3.bf16.msra.mxu0 %v1964_v62 }
 0x820   :  { %1819 = vmatmul.mubr.bf16.vlgmr.msra.gmra.mrb[12].mxu1 %v694_v27  ;;  %1830 = vmatprep.subr.bf16.mxu0 %v2045_v15 }
 0x821   :  { %1928 = vmatpush3.bf16.msra.mxu1 %v2299_v14 }
 0x822   :  { %1930 = vmatprep.subr.bf16.mxu1 %v2305_v25 }
 0x825   :  { %1932 = vmatpush3.bf16.msra.mxu1 %v2305_v25 }
 0x826   :  { %1934 = vmatprep.subr.bf16.mxu1 %v2313_v17 }
 0x829   :  { %1936 = vmatpush3.bf16.msra.mxu1 %v2313_v17 }
 0x82a   :  { %1938 = vmatprep.subr.bf16.mxu1 %v2319_v18 }
 0x82d   :  { %1940 = vmatpush3.bf16.msra.mxu1 %v2319_v18 }
 0x82e   :  { %1873 = vmatprep.subr.bf16.mxu1 %v2045_v15 }
 0x8f3   :  { %v800_v29 = vpop.f32.mrb[12].mxu1 }
 0x8f4   :  { %v801_v14 = vadd.f32 %v1583_v28, %v800_v29  ;;  %v1820_v30 = vpop.f32.mrb[13].mxu1 }
 0x8f5   :  { %v803_v31 = vpop.f32.mrb[14].mxu1 }
 0x8f6   :  { %v2479_v25 = vadd.f32 %v801_v14, %v2402_v52  ;;  %v804_v32 = vadd.f32 %v1583_v28, %v803_v31  ;;  %v1821_v37 = vpop.f32.mrb[15].mxu1 }
 0x8f8   :  { %v2482_v17 = vadd.f32 %v804_v32, %v2405_v57  ;;  %v813_v18 = vsel %vm72_vm0, %v2479_v25, 0.0 }
 0x8f9   :  { %814 = vadd.xlane.f32.xlu0 %v813_v18 }
 0x8fa   :  { %v816_v38 = vsel %vm72_vm0, %v2482_v17, 0.0 }
 0x8fb   :  { %817 = vadd.xlane.f32.xlu1 %v816_v38 }
 0x986   :  { %v815_v41 = vpop.xlane.xlu0 %814 }
 0x987   :  { %v819_v46 = vmul.f32 0.03125, %v815_v41 }
 0x988   :  { %v818_v49 = vpop.xlane.xlu1 %817 }
 0x989   :  { %v821_v51 = vsub.f32 %v2479_v25, %v819_v46  ;;  %v820_v52 = vmul.f32 0.03125, %v818_v49 }
 0x98b   :  { %v822_v54 = vsub.f32 %v2482_v17, %v820_v52  ;;  %v823_v56 = vmul.f32 %v821_v51, %v821_v51 }
 0x98d   :  { %v825_v57 = vsel %vm72_vm0, %v823_v56, 0.0  ;;  %v824_v58 = vmul.f32 %v822_v54, %v822_v54 }
 0x98e   :  { %826 = vadd.xlane.f32.xlu0 %v825_v57 }
 0x98f   :  { %v828_v59 = vsel %vm72_vm0, %v824_v58, 0.0 }
 0x990   :  { %829 = vadd.xlane.f32.xlu1 %v828_v59 }
 0xa1b   :  { %v827_v63 = vpop.xlane.xlu0 %826 }
 0xa1c   :  { %v831_v2 = vmul.f32 0.03125, %v827_v63 }
 0xa1d   :  { %v830_v0 = vpop.xlane.xlu1 %829 }
 0xa1e   :  { %v833_v3 = vadd.f32 1e-05, %v831_v2  ;;  %v832_v4 = vmul.f32 0.03125, %v830_v0 }
 0xa20   :  { %1997 = vrsqrt.f32 %v833_v3  ;;  %v834_v1 = vadd.f32 1e-05, %v832_v4 }
 0xa22   :  { %1999 = vrsqrt.f32 %v834_v1 }
 0xa2a   :  { %v1998_v5 = vpop.eup %1997 }
 0xa2b   :  { %v837_v53 = vmul.f32 %v1998_v5, %v821_v51 }
 0xa2c   :  { %v2000_v6 = vpop.eup %1999 }
 0xa2d   :  { %v845_v7 = vmul.f32 %v1594_v50, %v837_v53  ;;  %v838_v8 = vmul.f32 %v2000_v6, %v822_v54 }
 0xa2f   :  { %v846_v10 = vmul.f32 %v1594_v50, %v838_v8  ;;  %v853_v11 = vadd.f32 %v1595_v9, %v845_v7 }
 0xa31   :  { %v854_v12 = vadd.f32 %v1595_v9, %v846_v10 }
 0xa33   :  { %v855_v13 = vpack.c.bf16 %v854_v12, %v853_v11 }
 0xa35   :  { %1827 = vmatmul.mubr.msk.bf16.vlgmr.msra.gmra.mrb[12].mxu0 %vm72_vm0, %v855_v13 }
 0xa36   :  { %1838 = vmatprep.mubr.msk.bf16.mxu0 %vm2046_vm1, %v2045_v15 }
 0xb08   :  { %v918_v26 = vpop.f32.mrb[12].mxu0 }
 0xb09   :  { %v919_v22 = vadd.f32 %v1601_v16, %v918_v26  ;;  %v1828_v24 = vpop.f32.mrb[13].mxu0  ;;  %v1966_v26 = vld [vmem:[%s2674_s7 + $0x18] sm:$0xff]  }
 0xb0a   :  { %v921_v27 = vpop.f32.mrb[14].mxu0 }
 0xb0b   :  { %v922_v28 = vadd.f32 %v1601_v16, %v921_v27  ;;  %v1829_v29 = vpop.f32.mrb[15].mxu0  ;;  %v927_v14 = vmul.f32 %v919_v22, %v2234_v43  ;;  %v925_v30 = vmul.f32 %v919_v22, %v2238_v45  ;;  %v929_v31 = vmul.f32 %v919_v22, %v2245_v48  ;;  %v1965_v16 = vld [vmem:[%s2674_s7 + $0x10] sm:$0xff]  }
 0xb0c   :  { %v931_v32 = vmul.f32 %v919_v22, %v2261_v60  ;;  %v939_v37 = vmul.f32 %v919_v22, %v2346_v34  ;;  %v937_v18 = vmul.f32 %v919_v22, %v2333_v21  ;;  %v943_v38 = vmul.f32 %v919_v22, %v2358_v40 }
 0xb0d   :  { %v928_v41 = vmul.f32 %v922_v28, %v2236_v44  ;;  %v926_v46 = vmul.f32 %v922_v28, %v2232_v42  ;;  %v930_v49 = vmul.f32 %v922_v28, %v2243_v47  ;;  %v932_v43 = vmul.f32 %v922_v28, %v2251_v55 }
 0xb0e   :  { %v949_v51 = vpack.c.bf16 %v922_v28, %v919_v22  ;;  %v940_v45 = vmul.f32 %v922_v28, %v2344_v33  ;;  %v938_v48 = vmul.f32 %v922_v28, %v2331_v20  ;;  %v944_v60 = vmul.f32 %v922_v28, %v2356_v39 }
 0xb0f   :  { %v934_v34 = vpack.c.bf16 %v928_v41, %v927_v14  ;;  %v933_v52 = vpack.c.bf16 %v926_v46, %v925_v30  ;;  %v935_v21 = vpack.c.bf16 %v930_v49, %v929_v31  ;;  %v936_v54 = vpack.c.bf16 %v932_v43, %v931_v32  ;;  %v1614_v46 = vld [vmem:[%s2675_s8 + $0x1] ss:$0 sm:$0xff] }
 0xb10   :  { %v946_v40 = vpack.c.bf16 %v940_v45, %v939_v37  ;;  %v945_v56 = vpack.c.bf16 %v938_v48, %v937_v18  ;;  %v948_v44 = vpack.c.bf16 %v944_v60, %v943_v38  ;;  %v941_v42 = vmul.f32 %v919_v22, %v2350_v36 }
 0xb11   :  { %956 = vrot.lane.b32.xlu1 %v934_v34, %s2048_s25  ;;  %954 = vrot.lane.b32.xlu0 %v933_v52, %s2048_s25  ;;  %v942_v47 = vmul.f32 %v922_v28, %v2348_v35 }
 0xb13   :  { %v947_v55 = vpack.c.bf16 %v942_v47, %v941_v42 }
 0xb15   :  { %958 = vrot.lane.b32.xlu1 %v935_v21, %s2048_s25 }
 0xb19   :  { %960 = vrot.lane.b32.xlu1 %v936_v54, %s2048_s25 }
 0xb83   :  { %v955_v20 = vpop.permute.xlu0 %954  ;;  %v957_v39 = vpop.permute.xlu1 %956 }
 0xb84   :  { %v966_v33 = vsel %vm72_vm0, %v955_v20, 0  ;;  %v969_v57 = vsel %vm72_vm0, %v957_v39, 0  ;;  %v1967_v39 = vld [vmem:[%s2678_s11 + $0x10] sm:$0xff]  }
 0xb85   :  { %1831 = vmatpush3.bf16.xpose.msra.mxu0 %v966_v33 }
 0xb86   :  { %1832 = vmatprep.subr.bf16.mxu0 %v2045_v15 }
 0xb87   :  { %v959_v36 = vpop.permute.xlu1 %958 }
 0xb88   :  { %v972_v35 = vsel %vm72_vm0, %v959_v36, 0 }
 0xb8b   :  { %v961_v58 = vpop.permute.xlu1 %960 }
 0xb8c   :  { %v975_v59 = vsel %vm72_vm0, %v961_v58, 0 }
 0xb8d   :  { %1833 = vmatpush3.bf16.xpose.msra.mxu0 %v969_v57  ;;  %v1968_v57 = vld [vmem:[%s2678_s11 + $0x18] sm:$0xff]   ;;  %s2021_s11 = scalar_lea.vmem %s1553_s2, 256 }
 0xb8e   :  { %1834 = vmatprep.subr.bf16.mxu0 %v2045_v15  ;;  %p2022_p0 = scmp.ne.s32.totalorder %s1553_s2, %s2021_s11  ;;  %p2027_p2 = scmp.lt.s32.totalorder %s2021_s11, %s2021_s11 }
 0xb90   :  { %p2028_p3 = por %p2027_p2, %p2026_p1 }
 0xb92   :  { %p2029_p4 = pnand %p2028_p3, %p2022_p0 }
 0xb95   :  { %1835 = vmatpush3.bf16.xpose.msra.mxu0 %v972_v35 }
 0xb96   :  { %1836 = vmatprep.subr.bf16.mxu0 %v2045_v15 }
 0xb9d   :  { %1837 = vmatpush3.bf16.xpose.msra.mxu0 %v975_v59 }
 0xb9e   :  { %1861 = vmatprep.subr.bf16.mxu0 %v2045_v15 }
 0xba4   :  { %1839 = vmatmul.mubr.msk.bf16.vlgmr.msra.gmra.mrb[16].mxu0 %vm72_vm0, %v949_v51 }
 0xba5   :  { %1869 = vmatprep.mubr.msk.bf16.mxu0 %vm2046_vm1, %v2045_v15 }
 0xc77   :  { %v1011_v61 = vpop.f32.mrb[16].mxu0 }
 0xc78   :  { %v1012_v62 = vadd.f32 %v1011_v61, %v2329_v19  ;;  %v1840_v63 = vpop.f32.mrb[17].mxu0 }
 0xc79   :  { %v1014_v2 = vpop.f32.mrb[18].mxu0 }
 0xc7a   :  { %v1015_v0 = vadd.f32 %v1014_v2, %v2338_v23  ;;  %v1841_v3 = vpop.f32.mrb[19].mxu0  ;;  %v1018_v4 = vsel %vm333_vm2, %v1012_v62, -inf }
 0xc7b   :  { %1019 = vmax.xlane.f32.xlu0 %v1018_v4 }
 0xc7c   :  { %v1021_v1 = vsel %vm333_vm2, %v1015_v0, -inf }
 0xc7d   :  { %1022 = vmax.xlane.f32.xlu1 %v1021_v1 }
 0xc8e   :  { %1120 = vrot.lane.b32.xlu1 %v946_v40, %s2049_s26 }
 0xc91   :  { %1118 = vrot.lane.b32.xlu0 %v945_v56, %s2049_s26 }
 0xc92   :  { %1124 = vrot.lane.b32.xlu1 %v948_v44, %s2049_s26 }
 0xc95   :  { %1122 = vrot.lane.b32.xlu0 %v947_v55, %s2049_s26 }
 0xd08   :  { %v1020_v19 = vpop.xlane.xlu0 %1019 }
 0xd09   :  { %v1024_v5 = vsub.f32 %v1012_v62, %v1020_v19  ;;  %v1621_v19 = vld [vmem:[%s2677_s10 + $0x1] ss:$0 sm:$0xff] }
 0xd0a   :  { %v1023_v50 = vpop.xlane.xlu1 %1022 }
 0xd0b   :  { %v1026_v53 = vmul.f32 1.442695, %v1024_v5  ;;  %v1025_v23 = vsub.f32 %v1015_v0, %v1023_v50  ;;  %v1620_v0 = vld [vmem:[%s2676_s9 + $0x1] ss:$0 sm:$0xff] }
 0xd0c   :  { %v1119_v6 = vpop.permute.xlu0 %1118 }
 0xd0d   :  { %2001 = vpow2.f32 %v1026_v53  ;;  %v1028_v7 = vmul.f32 1.442695, %v1025_v23  ;;  %1862 = vmatpush3.bf16.msra.mxu0 %v1119_v6  ;;  %v1969_v6 = vld [vmem:[%s2680_s13 + $0x40] sm:$0xff]  }
 0xd0e   :  { %1863 = vmatprep.subr.bf16.mxu0 %v2045_v15  ;;  %v1121_v8 = vpop.permute.xlu1 %1120 }
 0xd0f   :  { %2003 = vpow2.f32 %v1028_v7  ;;  %v1970_v7 = vld [vmem:[%s2680_s13 + $0x48] sm:$0xff]  }
 0xd10   :  { %v1123_v9 = vpop.permute.xlu0 %1122 }
 0xd11   :  { %1864 = vmatpush3.bf16.msra.mxu0 %v1121_v8  ;;  %v1971_v8 = vld [vmem:[%s2680_s13 + $0x50] sm:$0xff]  }
 0xd12   :  { %1865 = vmatprep.subr.bf16.mxu0 %v2045_v15  ;;  %v1125_v11 = vpop.permute.xlu1 %1124 }
 0xd15   :  { %1866 = vmatpush3.bf16.msra.mxu0 %v1123_v9  ;;  %v1972_v9 = vld [vmem:[%s2680_s13 + $0x58] sm:$0xff]  }
 0xd16   :  { %1867 = vmatprep.subr.bf16.mxu0 %v2045_v15 }
 0xd17   :  { %v2002_v10 = vpop.eup %2001 }
 0xd18   :  { %1858 = vmatprep.mubr.msk.f32.mxu1 %vm333_vm2, %v2002_v10 }
 0xd19   :  { %v2004_v12 = vpop.eup %2003  ;;  %1868 = vmatpush3.bf16.msra.mxu0 %v1125_v11  ;;  %v1974_v11 = vld [vmem:[%s2680_s13 + $0x68] sm:$0xff]  }
 0xd1a   :  { %1859 = vmatmul.mubr.msk.f32.vlgmr.msra.gmra.mrb[6].mxu1 %vm333_vm2, %v2004_v12  ;;  %v1113_v13 = vpack.c.bf16 %v2004_v12, %v2002_v10  ;;  %1889 = vmatprep.subr.bf16.mxu0 %v2045_v15  ;;  %v1973_v10 = vld [vmem:[%s2680_s13 + $0x60] sm:$0xff]   ;;  %v1975_v12 = vld [vmem:[%s2680_s13 + $0x70] sm:$0xff]  }
 0xd1b   :  { %1877 = vmatprep.mubr.msk.bf16.mxu1 %vm2046_vm1, %v2045_v15  ;;  %1874 = vmatpush3.bf16.msra.mxu1 %v1965_v16  ;;  %v1627_v16 = vld [vmem:[%s2679_s12 + $0x1] ss:$0 sm:$0xff] }
 0xd1c   :  { %1870 = vmatmul.mubr.msk.bf16.vlgmr.msra.gmra.mrb[20].mxu0 %vm333_vm2, %v1113_v13  ;;  %1875 = vmatprep.subr.bf16.mxu1 %v2045_v15  ;;  %v1976_v13 = vld [vmem:[%s2680_s13 + $0x78] sm:$0xff]  }
 0xd1d   :  { %1905 = vmatprep.mubr.msk.bf16.mxu0 %vm2046_vm1, %v2045_v15  ;;  %1890 = vmatpush3.bf16.msra.mxu0 %v1969_v6 }
 0xd1e   :  { %1891 = vmatprep.subr.bf16.mxu0 %v2045_v15 }
 0xd1f   :  { %1876 = vmatpush3.bf16.msra.mxu1 %v1966_v26 }
 0xd20   :  { %1881 = vmatprep.subr.bf16.mxu1 %v2045_v15 }
 0xd21   :  { %1892 = vmatpush3.bf16.msra.mxu0 %v1970_v7  ;;  %v1658_v7 = vld [vmem:[%s2683_s16] ss:$0 sm:$0xff] }
 0xd22   :  { %1893 = vmatprep.subr.bf16.mxu0 %v2045_v15 }
 0xd25   :  { %1894 = vmatpush3.bf16.msra.mxu0 %v1971_v8 }
 0xd26   :  { %1895 = vmatprep.subr.bf16.mxu0 %v2045_v15 }
 0xd29   :  { %1896 = vmatpush3.bf16.msra.mxu0 %v1972_v9 }
 0xd2a   :  { %1897 = vmatprep.subr.bf16.mxu0 %v2045_v15 }
 0xd2d   :  { %1898 = vmatpush3.bf16.msra.mxu0 %v1973_v10 }
 0xd2e   :  { %1899 = vmatprep.subr.bf16.mxu0 %v2045_v15 }
 0xd31   :  { %1900 = vmatpush3.bf16.msra.mxu0 %v1974_v11 }
 0xd32   :  { %1901 = vmatprep.subr.bf16.mxu0 %v2045_v15 }
 0xd35   :  { %1902 = vmatpush3.bf16.msra.mxu0 %v1975_v12 }
 0xd36   :  { %1903 = vmatprep.subr.bf16.mxu0 %v2045_v15 }
 0xd39   :  { %1904 = vmatpush3.bf16.msra.mxu0 %v1976_v13 }
 0xded   :  { %v1860_v22 = vpop.f32.mrb[6].mxu1 }
 0xdee   :  { %v1112_v24 = vmax.f32 %v1860_v22, 1e-30  ;;  %v1102_v27 = vpop.f32.mrb[7].mxu1 }
 0xdef   :  { %v1111_v28 = vmax.f32 %v1102_v27, 1e-30  ;;  %v1167_v29 = vpop.f32.mrb[20].mxu0 }
 0xdf0   :  { %2005 = vrcp.f32 %v1112_v24  ;;  %v1871_v14 = vpop.f32.mrb[21].mxu0 }
 0xdf1   :  { %2007 = vrcp.f32 %v1111_v28  ;;  %v1170_v30 = vpop.f32.mrb[22].mxu0 }
 0xdf2   :  { %v1872_v31 = vpop.f32.mrb[23].mxu0 }
 0xdfa   :  { %v2006_v32 = vpop.eup %2005 }
 0xdfb   :  { %v2008_v37 = vpop.eup %2007  ;;  %v1177_v18 = vmul.f32 %v2006_v32, %v1170_v30 }
 0xdfc   :  { %v1176_v38 = vmul.f32 %v2008_v37, %v1167_v29 }
 0xdfe   :  { %v1178_v41 = vpack.c.bf16 %v1177_v18, %v1176_v38 }
 0xe00   :  { %1878 = vmatmul.mubr.msk.bf16.vlgmr.msra.gmra.mrb[16].mxu1 %vm72_vm0, %v1178_v41 }
 0xe01   :  { %1885 = vmatprep.mubr.msk.bf16.mxu1 %vm2046_vm1, %v2045_v15  ;;  %1882 = vmatpush3.bf16.msra.mxu1 %v1967_v39 }
 0xe02   :  { %1883 = vmatprep.subr.bf16.mxu1 %v2045_v15 }
 0xe05   :  { %1884 = vmatpush3.bf16.msra.mxu1 %v1968_v57 }
 0xed3   :  { %v1241_v49 = vpop.f32.mrb[16].mxu1 }
 0xed4   :  { %v1242_v43 = vadd.f32 %v1614_v46, %v1241_v49  ;;  %v1879_v51 = vpop.f32.mrb[17].mxu1 }
 0xed5   :  { %v1244_v45 = vpop.f32.mrb[18].mxu1 }
 0xed6   :  { %v2577_v48 = vadd.f32 %v1242_v43, %v2479_v25  ;;  %v1245_v60 = vadd.f32 %v1614_v46, %v1244_v45  ;;  %v1880_v34 = vpop.f32.mrb[19].mxu1 }
 0xed8   :  { %v2580_v52 = vadd.f32 %v1245_v60, %v2482_v17  ;;  %v1254_v21 = vsel %vm72_vm0, %v2577_v48, 0.0 }
 0xed9   :  { %1255 = vadd.xlane.f32.xlu0 %v1254_v21 }
 0xeda   :  { %v1257_v54 = vsel %vm72_vm0, %v2580_v52, 0.0 }
 0xedb   :  { %1258 = vadd.xlane.f32.xlu1 %v1257_v54 }
 0xf66   :  { %v1256_v40 = vpop.xlane.xlu0 %1255 }
 0xf67   :  { %v1260_v56 = vmul.f32 0.03125, %v1256_v40 }
 0xf68   :  { %v1259_v44 = vpop.xlane.xlu1 %1258 }
 0xf69   :  { %v1262_v42 = vsub.f32 %v2577_v48, %v1260_v56  ;;  %v1261_v25 = vmul.f32 0.03125, %v1259_v44  ;;  %v1648_v56 = vld [vmem:[%s2681_s14 + $0x1] ss:$0 sm:$0xff] }
 0xf6b   :  { %v1263_v47 = vsub.f32 %v2580_v52, %v1261_v25  ;;  %v1264_v55 = vmul.f32 %v1262_v42, %v1262_v42 }
 0xf6d   :  { %v1266_v17 = vsel %vm72_vm0, %v1264_v55, 0.0  ;;  %v1265_v20 = vmul.f32 %v1263_v47, %v1263_v47 }
 0xf6e   :  { %1267 = vadd.xlane.f32.xlu0 %v1266_v17 }
 0xf6f   :  { %v1269_v33 = vsel %vm72_vm0, %v1265_v20, 0.0 }
 0xf72   :  { %1270 = vadd.xlane.f32.xlu0 %v1269_v33 }
 0xffb   :  { %v1268_v36 = vpop.xlane.xlu0 %1267 }
 0xffc   :  { %v1272_v35 = vmul.f32 0.03125, %v1268_v36 }
 0xffe   :  { %v1274_v58 = vadd.f32 1e-05, %v1272_v35 }
 0xfff   :  { %v1271_v59 = vpop.xlane.xlu0 %1270 }
0x1000   :  { %2009 = vrsqrt.f32 %v1274_v58  ;;  %v1273_v61 = vmul.f32 0.03125, %v1271_v59 }
0x1002   :  { %v1275_v62 = vadd.f32 1e-05, %v1273_v61 }
0x1004   :  { %2011 = vrsqrt.f32 %v1275_v62 }
0x100a   :  { %v2010_v63 = vpop.eup %2009 }
0x100b   :  { %v1278_v2 = vmul.f32 %v2010_v63, %v1262_v42 }
0x100d   :  { %v1286_v4 = vmul.f32 %v1620_v0, %v1278_v2 }
0x100e   :  { %v2012_v3 = vpop.eup %2011 }
0x100f   :  { %v1279_v1 = vmul.f32 %v2012_v3, %v1263_v47  ;;  %v1294_v50 = vadd.f32 %v1621_v19, %v1286_v4 }
0x1011   :  { %v1287_v5 = vmul.f32 %v1620_v0, %v1279_v1 }
0x1013   :  { %v1295_v53 = vadd.f32 %v1621_v19, %v1287_v5 }
0x1015   :  { %v1296_v23 = vpack.c.bf16 %v1295_v53, %v1294_v50  ;;  %v1657_v53 = vld [vmem:[%s2682_s15] ss:$0 sm:$0xff] }
0x1017   :  { %1886 = vmatmul.mubr.msk.bf16.vlgmr.msra.gmra.mrb[20].mxu1 %vm72_vm0, %v1296_v23 }
0x10ea   :  { %v1359_v26 = vpop.f32.mrb[20].mxu1 }
0x10eb   :  { %v1360_v22 = vadd.f32 %v1627_v16, %v1359_v26  ;;  %v1887_v24 = vpop.f32.mrb[21].mxu1 }
0x10ec   :  { %v1362_v27 = vpop.f32.mrb[22].mxu1 }
0x10ed   :  { %v1366_v28 = vmul.f32 %v1360_v22, %v1360_v22  ;;  %v1363_v29 = vadd.f32 %v1627_v16, %v1362_v27  ;;  %v1888_v14 = vpop.f32.mrb[23].mxu1 }
0x10ef   :  { %v1368_v30 = vmul.f32 %v1366_v28, %v1360_v22  ;;  %v1367_v31 = vmul.f32 %v1363_v29, %v1363_v29 }
0x10f1   :  { %v1370_v32 = vmul.f32 0.044715, %v1368_v30  ;;  %v1369_v37 = vmul.f32 %v1367_v31, %v1363_v29 }
0x10f3   :  { %v1372_v18 = vadd.f32 %v1370_v32, %v1360_v22  ;;  %v1371_v38 = vmul.f32 0.044715, %v1369_v37 }
0x10f5   :  { %v1374_v41 = vmul.f32 0.7978846, %v1372_v18  ;;  %v1373_v15 = vadd.f32 %v1371_v38, %v1363_v29 }
0x10f7   :  { %2013 = vtanh.f32 %v1374_v41  ;;  %v1375_v46 = vmul.f32 0.7978846, %v1373_v15 }
0x10f9   :  { %2015 = vtanh.f32 %v1375_v46 }
0x1101   :  { %v2014_v49 = vpop.eup %2013 }
0x1102   :  { %v1378_v43 = vadd.f32 1.0, %v2014_v49 }
0x1103   :  { %v2016_v51 = vpop.eup %2015 }
0x1104   :  { %v1380_v45 = vmul.f32 0.5, %v1378_v43  ;;  %v1379_v60 = vadd.f32 1.0, %v2016_v51 }
0x1106   :  { %v1381_v34 = vmul.f32 0.5, %v1379_v60  ;;  %v1382_v21 = vmul.f32 %v1380_v45, %v1360_v22 }
0x1108   :  { %v1383_v54 = vmul.f32 %v1381_v34, %v1363_v29 }
0x110a   :  { %v1384_v40 = vpack.c.bf16 %v1383_v54, %v1382_v21 }
0x110c   :  { %1906 = vmatmul.mubr.bf16.vlgmr.msra.gmra.mrb[24].mxu0 %v1384_v40 }
0x11df   :  { %v1492_v44 = vpop.f32.mrb[24].mxu0 }
0x11e0   :  { %v1493_v42 = vadd.f32 %v1648_v56, %v1492_v44  ;;  %v1907_v25 = vpop.f32.mrb[25].mxu0 }
0x11e1   :  { %v1495_v47 = vpop.f32.mrb[26].mxu0 }
0x11e2   :  { %v1496_v55 = vadd.f32 %v1648_v56, %v1495_v47  ;;  %v1908_v17 = vpop.f32.mrb[27].mxu0  ;;  %v1499_v20 = vadd.f32 %v1493_v42, %v2577_v48 }
0x11e4   :  { %v1503_v33 = vsel %vm72_vm0, %v1499_v20, 0.0  ;;  %v1500_v39 = vadd.f32 %v1496_v55, %v2580_v52 }
0x11e5   :  { %1504 = vadd.xlane.f32.xlu0 %v1503_v33 }
0x11e6   :  { %v1506_v57 = vsel %vm72_vm0, %v1500_v39, 0.0 }
0x11e7   :  { %1507 = vadd.xlane.f32.xlu1 %v1506_v57 }
0x1272   :  { %v1505_v36 = vpop.xlane.xlu0 %1504 }
0x1273   :  { %v1509_v35 = vmul.f32 0.03125, %v1505_v36 }
0x1274   :  { %v1508_v58 = vpop.xlane.xlu1 %1507 }
0x1275   :  { %v1511_v59 = vsub.f32 %v1499_v20, %v1509_v35  ;;  %v1510_v61 = vmul.f32 0.03125, %v1508_v58 }
0x1277   :  { %v1512_v62 = vsub.f32 %v1500_v39, %v1510_v61  ;;  %v1513_v63 = vmul.f32 %v1511_v59, %v1511_v59 }
0x1279   :  { %v1515_v2 = vsel %vm72_vm0, %v1513_v63, 0.0  ;;  %v1514_v0 = vmul.f32 %v1512_v62, %v1512_v62 }
0x127a   :  { %1516 = vadd.xlane.f32.xlu0 %v1515_v2 }
0x127b   :  { %v1518_v48 = vsel %vm72_vm0, %v1514_v0, 0.0 }
0x127c   :  { %1519 = vadd.xlane.f32.xlu1 %v1518_v48 }
0x1307   :  { %v1517_v3 = vpop.xlane.xlu0 %1516 }
0x1308   :  { %v1521_v52 = vmul.f32 0.03125, %v1517_v3 }
0x1309   :  { %v1520_v4 = vpop.xlane.xlu1 %1519 }
0x130a   :  { %v1523_v1 = vadd.f32 1e-05, %v1521_v52  ;;  %v1522_v19 = vmul.f32 0.03125, %v1520_v4 }
0x130c   :  { %2017 = vrsqrt.f32 %v1523_v1  ;;  %v1524_v5 = vadd.f32 1e-05, %v1522_v19 }
0x130e   :  { %2019 = vrsqrt.f32 %v1524_v5 }
0x1316   :  { %v2018_v50 = vpop.eup %2017 }
0x1317   :  { %v1527_v23 = vmul.f32 %v2018_v50, %v1511_v59 }
0x1318   :  { %v2020_v6 = vpop.eup %2019 }
0x1319   :  { %v1528_v8 = vmul.f32 %v2020_v6, %v1512_v62  ;;  %v1535_v9 = vmul.f32 %v1657_v53, %v1527_v23 }
0x131b   :  { %v1536_v10 = vmul.f32 %v1657_v53, %v1528_v8  ;;  %v1543_v11 = vadd.f32 %v1658_v7, %v1535_v9 }
0x131d   :  { %v1544_v12 = vadd.f32 %v1658_v7, %v1536_v10  ;;  %1545 = vst.msk [vmem:[#allocation2] sm:$0xff] %vm72_vm0, %v1543_v11 }
0x131f   :  { %1546 = vst.msk [vmem:[#allocation2 + $0x8] sm:$0xff] %vm72_vm0, %v1544_v12 }
0x1320   :  { %2032 = shalt.err (!%p2029_p4)
}
0x1321   :  { %s2033_s23 = scalar_lea.hbm %s2684_s17, 256 }
0x1322   :  { %p2034_p5 = scmp.ne.s32.totalorder %s2684_s17, %s2033_s23  ;;  %p2037_p6 = scmp.lt.u32.totalorder %s2033_s23, %s2684_s17 }
0x1324   :  { %p2039_p7 = pnand %p2037_p6, %p2034_p5 }
0x1326   :  { %2042 = shalt.err (!%p2039_p7)
}
0x1327   :  { %s2051_s10 = smov 128   ;;  %s2052_s28 = smov 8  }
0x1328   :  { %1558 = dma.vmem_to_hbm [thread:$0]  %s1553_s2, 256, %s2684_s17, [#allocation3], %s2051_s10, %s2051_s10, %s2052_s28  }
0x1329   :  { %2043 = dma.done.wait [#allocation3], 256  }
0x132a   :  { %2044 = vsyncadd [#allocation3], 4294967040 }
0x132b   :  { %1562 = vsyncpa [#allocation3], 1 }

</bundles_post_ra>
